<compile_context>
chip_gen: v5e
topology: v5e:2x2
jax: 0.10.0
libtpu: 0.0.40
codegen_flags: <defaults>
</compile_context>

<pallas_src>
import math

import jax
import jax.numpy as jnp
from jax import lax
from jax.experimental import pallas as pl
from jax.experimental.pallas import tpu as pltpu

_INV_SQRT2 = 1.0 / math.sqrt(2.0)


def _round_up(n, m):
    return ((n + m - 1) // m) * m


def _vmem_cap_bytes():
    """~85% of the physical per-core VMEM (v5e/v6e: 128 MiB, v7x: 64 MiB per TC)."""
    try:
        cap = int(pltpu.get_tpu_info().vmem_capacity_bytes)
    except Exception:
        cap = 64 << 20  # conservative fallback = v7x per-TensorCore VMEM
    return int(cap * 0.85)


def _const_spec(shape, index_map):
    """BlockSpec for a block whose index never changes (resident weights / biases).

    Single-buffered (pl.Buffered(1)) so the pipeline does not allocate a useless
    second copy; falls back to a plain BlockSpec if this jax build does not
    accept pipeline_mode.
    """
    try:
        return pl.BlockSpec(shape, index_map, pipeline_mode=pl.Buffered(1))
    except Exception:
        return pl.BlockSpec(shape, index_map)


def _pick_th(Hp, preferred):
    """Largest hidden-chunk size (multiple of 128) that divides the padded hidden dim."""
    preferred = min(preferred, Hp)
    if preferred >= 128 and preferred % 128 == 0 and Hp % preferred == 0:
        return preferred
    for cand in (1024, 512, 256, 128):
        if cand <= Hp and Hp % cand == 0:
            return cand
    return Hp


def _resident_vmem_bytes(tm, Dp, Hp, out_bytes):
    weights = (Dp * Hp + Hp * Dp) * 2 + (Hp + Dp) * 4          # single-buffered
    io = 2 * (tm * Dp * 2) + 2 * (tm * Dp * out_bytes)          # x in / out tiles (double-buffered)
    tmp = tm * Hp * 4 + tm * Hp * 2 + tm * Dp * 4               # f32 h, bf16 h, f32 out
    return weights + io + tmp


def _tiled_vmem_bytes(tm, th, Dp, out_bytes):
    weights = 2 * (Dp * th * 2 + th * Dp * 2 + th * 4) + Dp * 4  # streamed W1/W2/b1 chunks + b2
    io = 2 * (tm * Dp * 2) + 2 * (tm * Dp * out_bytes)
    acc = tm * Dp * 4
    tmp = tm * th * 4 + tm * th * 2 + tm * Dp * 4
    return weights + io + acc + tmp


# --------------------------------------------------------------------------- kernels


def _ffn_resident_kernel(x_ref, w1_ref, b1_ref, w2_ref, b2_ref, o_ref):
    # x_ref:(tm,Dp) bf16 | w1_ref:(Dp,Hp) bf16 | b1_ref:(1,Hp) f32
    # w2_ref:(Hp,Dp) bf16 | b2_ref:(1,Dp) f32  | o_ref:(tm,Dp)
    h = jnp.dot(x_ref[...], w1_ref[...], preferred_element_type=jnp.float32)
    h = h + b1_ref[...]
    # exact GELU (matches torch.nn.GELU default): 0.5*x*(1+erf(x/sqrt(2)))
    h = 0.5 * h * (1.0 + lax.erf(h * _INV_SQRT2))
    out = jnp.dot(h.astype(jnp.bfloat16), w2_ref[...], preferred_element_type=jnp.float32)
    o_ref[...] = (out + b2_ref[...]).astype(o_ref.dtype)


def _ffn_tiled_kernel(x_ref, w1_ref, b1_ref, w2_ref, b2_ref, o_ref, acc_ref):
    # Hidden-dimension-tiled path: grid = (row tiles, hidden chunks).
    # x_ref:(tm,Dp) bf16 (resident across k) | w1_ref:(Dp,th) bf16 | b1_ref:(1,th) f32
    # w2_ref:(th,Dp) bf16 | b2_ref:(1,Dp) f32 | acc_ref:(tm,Dp) f32 scratch
    k = pl.program_id(1)

    @pl.when(k == 0)
    def _():
        acc_ref[...] = jnp.zeros_like(acc_ref)

    h = jnp.dot(x_ref[...], w1_ref[...], preferred_element_type=jnp.float32)
    h = h + b1_ref[...]
    h = 0.5 * h * (1.0 + lax.erf(h * _INV_SQRT2))
    acc_ref[...] += jnp.dot(h.astype(jnp.bfloat16), w2_ref[...],
                            preferred_element_type=jnp.float32)

    @pl.when(k == pl.num_programs(1) - 1)
    def _():
        o_ref[...] = (acc_ref[...] + b2_ref[...]).astype(o_ref.dtype)


# --------------------------------------------------------------------------- wrapper


def prepare_ffn_params(w1, b1, w2, b2):
    """Pad params to lane-dense (128-multiple) shapes and cast weights to bf16 ONCE.

    Padded hidden/dim COLUMNS are zero, so they contribute exactly 0 to the f32
    accumulators (GELU(0) = 0 and the padded W2 rows are 0).
    """
    dim, hidden = w1.shape
    Dp = _round_up(dim, 128)
    Hp = _round_up(hidden, 128)
    if (Dp, Hp) != (dim, hidden):
        w1 = jnp.pad(w1, ((0, Dp - dim), (0, Hp - hidden)))
        w2 = jnp.pad(w2, ((0, Hp - hidden), (0, Dp - dim)))
        b1 = jnp.pad(b1, (0, Hp - hidden))
        b2 = jnp.pad(b2, (0, Dp - dim))
    return {
        "w1": w1.astype(jnp.bfloat16),
        "b1": b1.reshape(1, Hp).astype(jnp.float32),
        "w2": w2.astype(jnp.bfloat16),
        "b2": b2.reshape(1, Dp).astype(jnp.float32),
        "dim": dim,
        "hidden": hidden,
    }


def feed_forward(x, params, *, tm=None, th=None, out_dtype=None, force_tiled=False):
    """x: [B, N, dim]; params from prepare_ffn_params (pre-padded, bf16 weights)."""
    B, N, dim_in = x.shape
    dim, hidden = params["dim"], params["hidden"]
    assert dim_in == dim, "input feature dim does not match parameters"
    w1, b1, w2, b2 = params["w1"], params["b1"], params["w2"], params["b2"]
    Dp, Hp = w1.shape
    rows = B * N
    out_dtype = x.dtype if out_dtype is None else out_dtype
    out_bytes = jnp.dtype(out_dtype).itemsize

    if tm is None:
        # 256-row LHS tiles fill the 256-wide MXU on v6e/v7x; 128 is a native fill on v5e
        # and avoids pointless padding for small row counts.
        tm = 128 if rows <= 128 else 256
    Rp = _round_up(rows, tm)

    # Per-call activation padding (cheap relative to the weights).
    # NOTE: padded ROWS are NOT zero after the first bias add (h = b1, GELU(b1) != 0);
    # correctness relies on slicing them off at the end.  Only the padded hidden/dim
    # COLUMNS (handled in prepare_ffn_params) are genuinely zero contributions.
    x2 = x.reshape(rows, dim)
    if (Rp, Dp) != (rows, dim):
        x2 = jnp.pad(x2, ((0, Rp - rows), (0, Dp - dim)))
    xb = x2.astype(jnp.bfloat16)

    cap = _vmem_cap_bytes()
    use_tiled = force_tiled or _resident_vmem_bytes(tm, Dp, Hp, out_bytes) > cap

    if not use_tiled:
        budget = _resident_vmem_bytes(tm, Dp, Hp, out_bytes)
        vmem_limit = int(min(cap, max(int(budget * 1.25) + (4 << 20), 32 << 20)))
        out = pl.pallas_call(
            _ffn_resident_kernel,
            out_shape=jax.ShapeDtypeStruct((Rp, Dp), out_dtype),
            grid_spec=pltpu.PrefetchScalarGridSpec(
                num_scalar_prefetch=0,
                grid=(Rp // tm,),
                in_specs=[
                    pl.BlockSpec((tm, Dp), lambda i: (i, 0)),   # x rows tile (pipelined)
                    _const_spec((Dp, Hp), lambda i: (0, 0)),    # W1 resident, single-buffered
                    _const_spec((1, Hp), lambda i: (0, 0)),     # b1
                    _const_spec((Hp, Dp), lambda i: (0, 0)),    # W2 resident, single-buffered
                    _const_spec((1, Dp), lambda i: (0, 0)),     # b2
                ],
                out_specs=pl.BlockSpec((tm, Dp), lambda i: (i, 0)),
            ),
            compiler_params=pltpu.CompilerParams(
                dimension_semantics=("parallel",),              # row axis shards across TCs
                vmem_limit_bytes=vmem_limit,
            ),
        )(xb, w1, b1, w2, b2)
    else:
        th = _pick_th(Hp, 512 if th is None else th)
        budget = _tiled_vmem_bytes(tm, th, Dp, out_bytes)
        vmem_limit = int(min(cap, max(int(budget * 1.25) + (4 << 20), 32 << 20)))
        out = pl.pallas_call(
            _ffn_tiled_kernel,
            out_shape=jax.ShapeDtypeStruct((Rp, Dp), out_dtype),
            grid_spec=pltpu.PrefetchScalarGridSpec(
                num_scalar_prefetch=0,
                grid=(Rp // tm, Hp // th),
                in_specs=[
                    pl.BlockSpec((tm, Dp), lambda i, k: (i, 0)),  # x tile, resident across k
                    pl.BlockSpec((Dp, th), lambda i, k: (0, k)),  # W1 hidden chunk (streamed)
                    pl.BlockSpec((1, th), lambda i, k: (0, k)),   # b1 chunk
                    pl.BlockSpec((th, Dp), lambda i, k: (k, 0)),  # W2 hidden chunk (streamed)
                    _const_spec((1, Dp), lambda i, k: (0, 0)),    # b2
                ],
                out_specs=pl.BlockSpec((tm, Dp), lambda i, k: (i, 0)),
                scratch_shapes=[pltpu.VMEM((tm, Dp), jnp.float32)],
            ),
            compiler_params=pltpu.CompilerParams(
                dimension_semantics=("parallel", "arbitrary"),
                vmem_limit_bytes=vmem_limit,
            ),
        )(xb, w1, b1, w2, b2)

    return out[:rows, :dim].reshape(B, N, dim).astype(out_dtype)


# --------------------------------------------------------------------------- references


def _reference_f32(x, w1, b1, w2, b2):
    h = jnp.einsum("bnd,dh->bnh", x, w1) + b1
    h = 0.5 * h * (1.0 + lax.erf(h * _INV_SQRT2))
    return jnp.einsum("bnh,hd->bnd", h, w2) + b2


def _reference_bf16(x, w1, b1, w2, b2):
    # Same bf16-matmul / f32-accumulate recipe as the kernel (intentional precision
    # trade vs torch's f32 Linear layers).
    h = jnp.einsum("bnd,dh->bnh", x.astype(jnp.bfloat16), w1.astype(jnp.bfloat16),
                   preferred_element_type=jnp.float32) + b1
    h = 0.5 * h * (1.0 + lax.erf(h * _INV_SQRT2))
    return jnp.einsum("bnh,hd->bnd", h.astype(jnp.bfloat16), w2.astype(jnp.bfloat16),
                      preferred_element_type=jnp.float32) + b2


def _make_params(key, dim, hidden):
    kw1, kb1, kw2, kb2 = jax.random.split(key, 4)
    w1 = jax.random.normal(kw1, (dim, hidden), jnp.float32) * (1.0 / math.sqrt(dim))
    b1 = jax.random.normal(kb1, (hidden,), jnp.float32) * 0.01
    w2 = jax.random.normal(kw2, (hidden, dim), jnp.float32) * (1.0 / math.sqrt(hidden))
    b2 = jax.random.normal(kb2, (dim,), jnp.float32) * 0.01
    return w1, b1, w2, b2


if __name__ == "__main__":
    key = jax.random.PRNGKey(0)
    k0, k1, k2, k3 = jax.random.split(key, 4)

    # --- small resident-weight case: batch=2, seq=8, dim=32, hidden=64 ---------------
    B, N, dim, hidden = 2, 8, 32, 64
    x = jax.random.normal(k0, (B, N, dim), dtype=jnp.float32)
    w1, b1, w2, b2 = _make_params(k1, dim, hidden)
    params = prepare_ffn_params(w1, b1, w2, b2)   # pad + bf16-cast once, off the hot path

    y = feed_forward(x, params)
    jax.block_until_ready(y)

    y_bf = _reference_bf16(x, w1, b1, w2, b2)
    assert jnp.allclose(y, y_bf, atol=2e-2, rtol=2e-2), "resident: mismatch vs bf16 reference"
    y_f32 = _reference_f32(x, w1, b1, w2, b2)
    assert jnp.allclose(y, y_f32, atol=1e-1, rtol=1e-1), "resident: mismatch vs f32 reference"

    # --- exercise the hidden-tiled accumulator path (>=2 hidden chunks) --------------
    dim2, hidden2 = 64, 256
    x2 = jax.random.normal(k2, (B, N, dim2), dtype=jnp.float32)
    w1b_, b1b_, w2b_, b2b_ = _make_params(k3, dim2, hidden2)
    params2 = prepare_ffn_params(w1b_, b1b_, w2b_, b2b_)

    y2 = feed_forward(x2, params2, force_tiled=True, th=128)
    jax.block_until_ready(y2)

    y2_bf = _reference_bf16(x2, w1b_, b1b_, w2b_, b2b_)
    assert jnp.allclose(y2, y2_bf, atol=2e-2, rtol=2e-2), "tiled: mismatch vs bf16 reference"
    y2_f32 = _reference_f32(x2, w1b_, b1b_, w2b_, b2b_)
    assert jnp.allclose(y2, y2_f32, atol=1e-1, rtol=1e-1), "tiled: mismatch vs f32 reference"

    print("KERNEL_OK")
</pallas_src>

<mosaic_0001>
module attributes {stable_mosaic.version = 11 : i64} {
  func.func @_ffn_resident_kernel(%arg0: i32, %arg1: memref<128x128xbf16, #tpu.memory_space<vmem>>, %arg2: memref<128x128xbf16, #tpu.memory_space<vmem>>, %arg3: memref<1x128xf32, #tpu.memory_space<vmem>>, %arg4: memref<128x128xbf16, #tpu.memory_space<vmem>>, %arg5: memref<1x128xf32, #tpu.memory_space<vmem>>, %arg6: memref<128x128xf32, #tpu.memory_space<vmem>>) attributes {dimension_semantics = [#tpu.dimension_semantics<parallel>], iteration_bounds = array<i64: 1>, scalar_prefetch = 0 : i64, scratch_operands = 0 : i64, tpu.core_type = #tpu.core_type<tc>, window_params = [{transform_indices = @transform_0, window_bounds = array<i64: 128, 128>}, {pipeline_mode = #tpu.pipeline_mode<synchronous>, transform_indices = @transform_1, window_bounds = array<i64: 128, 128>}, {pipeline_mode = #tpu.pipeline_mode<synchronous>, transform_indices = @transform_2, window_bounds = array<i64: 1, 128>}, {pipeline_mode = #tpu.pipeline_mode<synchronous>, transform_indices = @transform_3, window_bounds = array<i64: 128, 128>}, {pipeline_mode = #tpu.pipeline_mode<synchronous>, transform_indices = @transform_4, window_bounds = array<i64: 1, 128>}, {transform_indices = @transform_5, window_bounds = array<i64: 128, 128>}]} {
    %c0 = arith.constant 0 : index
    %c0_0 = arith.constant 0 : index
    %0 = vector.load %arg1[%c0, %c0_0] : memref<128x128xbf16, #tpu.memory_space<vmem>>, vector<128x128xbf16>
    %c0_1 = arith.constant 0 : index
    %c0_2 = arith.constant 0 : index
    %1 = vector.load %arg2[%c0_1, %c0_2] : memref<128x128xbf16, #tpu.memory_space<vmem>>, vector<128x128xbf16>
    %cst = arith.constant dense<0.000000e+00> : vector<128x128xf32>
    %2 = tpu.matmul %0, %1, %cst {dimension_numbers = #tpu.dot_dimension_numbers<[1], [0], [0], [1], [0, 0, 1, 1], [], []>} : vector<128x128xbf16>, vector<128x128xbf16>, vector<128x128xf32> -> vector<128x128xf32>
    %c0_3 = arith.constant 0 : index
    %c0_4 = arith.constant 0 : index
    %3 = vector.load %arg3[%c0_3, %c0_4] : memref<1x128xf32, #tpu.memory_space<vmem>>, vector<1x128xf32>
    %4 = vector.broadcast %3 : vector<1x128xf32> to vector<128x128xf32>
    %5 = arith.addf %2, %4 : vector<128x128xf32>
    %cst_5 = arith.constant 5.000000e-01 : f32
    %6 = vector.broadcast %cst_5 : f32 to vector<128x128xf32>
    %7 = arith.mulf %6, %5 : vector<128x128xf32>
    %cst_6 = arith.constant 0.707106769 : f32
    %8 = vector.broadcast %cst_6 : f32 to vector<128x128xf32>
    %9 = arith.mulf %5, %8 : vector<128x128xf32>
    %10 = math.erf %9 : vector<128x128xf32>
    %cst_7 = arith.constant 1.000000e+00 : f32
    %11 = vector.broadcast %cst_7 : f32 to vector<128x128xf32>
    %12 = arith.addf %11, %10 : vector<128x128xf32>
    %13 = arith.mulf %7, %12 : vector<128x128xf32>
    %14 = arith.truncf %13 : vector<128x128xf32> to vector<128x128xbf16>
    %c0_8 = arith.constant 0 : index
    %c0_9 = arith.constant 0 : index
    %15 = vector.load %arg4[%c0_8, %c0_9] : memref<128x128xbf16, #tpu.memory_space<vmem>>, vector<128x128xbf16>
    %cst_10 = arith.constant dense<0.000000e+00> : vector<128x128xf32>
    %16 = tpu.matmul %14, %15, %cst_10 {dimension_numbers = #tpu.dot_dimension_numbers<[1], [0], [0], [1], [0, 0, 1, 1], [], []>} : vector<128x128xbf16>, vector<128x128xbf16>, vector<128x128xf32> -> vector<128x128xf32>
    %c0_11 = arith.constant 0 : index
    %c0_12 = arith.constant 0 : index
    %17 = vector.load %arg5[%c0_11, %c0_12] : memref<1x128xf32, #tpu.memory_space<vmem>>, vector<1x128xf32>
    %18 = vector.broadcast %17 : vector<1x128xf32> to vector<128x128xf32>
    %19 = arith.addf %16, %18 : vector<128x128xf32>
    %c0_13 = arith.constant 0 : index
    %c0_14 = arith.constant 0 : index
    %20 = vector.load %arg6[%c0_13, %c0_14] : memref<128x128xf32, #tpu.memory_space<vmem>>, vector<128x128xf32>
    tpu.vector_store %arg6[%c0_13, %c0_14], %19 {strides = array<i32>} : memref<128x128xf32, #tpu.memory_space<vmem>>, vector<128x128xf32>,
    return
  }
  func.func @transform_0(%arg0: i32) -> (i32, i32) {
    %c0_i32 = arith.constant 0 : i32
    %c0_i32_0 = arith.constant 0 : i32
    return %arg0, %c0_i32 : i32, i32
  }
  func.func @transform_1(%arg0: i32) -> (i32, i32) {
    %c0_i32 = arith.constant 0 : i32
    %c0_i32_0 = arith.constant 0 : i32
    %c0_i32_1 = arith.constant 0 : i32
    return %c0_i32, %c0_i32_0 : i32, i32
  }
  func.func @transform_2(%arg0: i32) -> (i32, i32) {
    %c0_i32 = arith.constant 0 : i32
    %c0_i32_0 = arith.constant 0 : i32
    %c0_i32_1 = arith.constant 0 : i32
    return %c0_i32, %c0_i32_0 : i32, i32
  }
  func.func @transform_3(%arg0: i32) -> (i32, i32) {
    %c0_i32 = arith.constant 0 : i32
    %c0_i32_0 = arith.constant 0 : i32
    %c0_i32_1 = arith.constant 0 : i32
    return %c0_i32, %c0_i32_0 : i32, i32
  }
  func.func @transform_4(%arg0: i32) -> (i32, i32) {
    %c0_i32 = arith.constant 0 : i32
    %c0_i32_0 = arith.constant 0 : i32
    %c0_i32_1 = arith.constant 0 : i32
    return %c0_i32, %c0_i32_0 : i32, i32
  }
  func.func @transform_5(%arg0: i32) -> (i32, i32) {
    %c0_i32 = arith.constant 0 : i32
    %c0_i32_0 = arith.constant 0 : i32
    return %arg0, %c0_i32 : i32, i32
  }
}

</mosaic_0001>

<bundles_post_ra>
// kernel: tpu_custom_call.1
= control target key start
LH: loop header
LB: loop body
LE: loop exit
PB: predicated region body
PF: predicated region fallthrough
CT: control target
= control target key end

     0   :  { %10 = vsyncpa [#allocation3], 0  ;;  %s2126_s0 = inlined_call_operand.hbm [shape: bf16[128,128], index: 0, kind: input, shape index: {}]   ;;  %s2127_s1 = inlined_call_operand.hbm [shape: bf16[128,128], index: 1, kind: input, shape index: {}]   ;;  %s2128_s2 = inlined_call_operand.vmem [shape: f32[1,128], index: 2, kind: input, shape index: {}]   ;;  %s2129_s3 = inlined_call_operand.hbm [shape: bf16[128,128], index: 3, kind: input, shape index: {}]   ;;  %s2130_s4 = inlined_call_operand.vmem [shape: f32[1,128], index: 4, kind: input, shape index: {}]   ;;  %s2131_s5 = inlined_call_operand.hbm [shape: f32[128,128], index: 5, kind: output, shape index: {}]  }
   0x1   :  { %11 = vsyncpa [#allocation6], 0 }
   0x2   :  { %12 = vsyncpa [#allocation4], 0  ;;  %s30_s20 = sshll.u32 %s2127_s1, 4  ;;  %s1410_s21 = smov [#allocation5]   ;;  %s31_s20 = int_to_ptr.hbm [resolvable:$true] %s30_s20 }
   0x3   :  { %s32_s22 = sshll.u32 %s1410_s21, 4  ;;  %s17_s25 = sshll.u32 %s2126_s0, 4  ;;  %s33_s22 = int_to_ptr.vmem [resolvable:$true] %s32_s22  ;;  %s18_s25 = int_to_ptr.hbm [resolvable:$true] %s17_s25 }
   0x4   :  { %s1411_s26 = smov 64   ;;  %s1412_s27 = smov 4  }
   0x5   :  { %38 = dma.hbm_to_vmem [thread:$0]  %s31_s20, 1024, %s33_s22, [#allocation6], %s1411_s26, %s1411_s26, %s1412_s27  }
   0x6   :  { %s1413_s28 = smov [#allocation2]   ;;  %s45_s7 = sshll.u32 %s2129_s3, 4  ;;  %s46_s7 = int_to_ptr.hbm [resolvable:$true] %s45_s7 }
   0x7   :  { %s19_s29 = sshll.u32 %s1413_s28, 4  ;;  %s1414_s1 = smov [#allocation7]   ;;  %s20_s29 = int_to_ptr.vmem [resolvable:$true] %s19_s29 }
   0x8   :  { %25 = dma.hbm_to_vmem [thread:$0]  %s18_s25, 1024, %s20_s29, [#allocation3], %s1411_s26, %s1411_s26, %s1412_s27  }
   0x9   :  { %s47_s8 = sshll.u32 %s1414_s1, 4  ;;  %s48_s8 = int_to_ptr.vmem [resolvable:$true] %s47_s8 }
   0xa   :  { %53 = dma.hbm_to_vmem [thread:$0]  %s46_s7, 1024, %s48_s8, [#allocation6], %s1411_s26, %s1411_s26, %s1412_s27  }
   0xb   :  { %1404 = dma.done.wait [#allocation3], 1024  }
   0xc   :  { %1405 = vsyncadd [#allocation3], 4294966272 }
   0xd   :  { %1406 = dma.done.wait [#allocation6], 2048  }
   0xe   :  { %1407 = vsyncadd [#allocation6], 4294965248  ;;  %v1241_v0 = vld [vmem:[#allocation5 + $0x38] sm:$0xff]  ;;  %v1240_v1 = vld [vmem:[#allocation5 + $0x30] sm:$0xff]  ;;  %s1100_s13 = sshll.u32 %s2131_s5, 4  ;;  %s1416_s14 = smov 128   ;;  %s1101_s13 = int_to_ptr.hbm [resolvable:$true] %s1100_s13 }
   0xf   :  { %200 = vmatpush.bf16.msra.mxu0 %v1241_v0  ;;  %1250 = vmatpush.bf16.msra.mxu2 %v1241_v0  ;;  %v1239_v2 = vld [vmem:[#allocation5 + $0x28] sm:$0xff]  ;;  %v1238_v3 = vld [vmem:[#allocation5 + $0x20] sm:$0xff]  ;;  %v1237_v4 = vld [vmem:[#allocation5 + $0x18] sm:$0xff]  ;;  %s1417_s15 = smov 8  }
  0x10   :  { %v1236_v5 = vld [vmem:[#allocation5 + $0x10] sm:$0xff]  ;;  %v1235_v6 = vld [vmem:[#allocation5 + $0x8] sm:$0xff]  ;;  %v1234_v7 = vld [vmem:[#allocation5] sm:$0xff] }
  0x11   :  { %v1226_v8 = vld [vmem:[#allocation2] sm:$0xff]  ;;  %v1227_v10 = vld [vmem:[#allocation2 + $0x8] sm:$0xff]  ;;  %v1228_v12 = vld [vmem:[#allocation2 + $0x10] sm:$0xff] }
  0x12   :  { %v1230_v9 = vld [vmem:[#allocation2 + $0x20] sm:$0xff]  ;;  %v1231_v11 = vld [vmem:[#allocation2 + $0x28] sm:$0xff]  ;;  %v1232_v13 = vld [vmem:[#allocation2 + $0x30] sm:$0xff] }
  0x13   :  { %201 = vmatpush.bf16.msra.mxu0 %v1240_v1  ;;  %1251 = vmatpush.bf16.msra.mxu2 %v1240_v1  ;;  %v1229_v14 = vld [vmem:[#allocation2 + $0x18] sm:$0xff]  ;;  %v1460_v16 = vld [vmem:[%s2128_s2] ss:$0 sm:$0xff]  ;;  %v1248_v22 = vld [vmem:[#allocation7 + $0x30] sm:$0xff] }
  0x14   :  { %v1233_v15 = vld [vmem:[#allocation2 + $0x38] sm:$0xff]  ;;  %v1247_v30 = vld [vmem:[#allocation7 + $0x28] sm:$0xff]  ;;  %v1246_v38 = vld [vmem:[#allocation7 + $0x20] sm:$0xff] }
  0x15   :  { %v1249_v19 = vld [vmem:[#allocation7 + $0x38] sm:$0xff]  ;;  %v1244_v57 = vld [vmem:[#allocation7 + $0x10] sm:$0xff] }
  0x16   :  { %1029 = vmatpush.bf16.msra.mxu1 %v1249_v19  ;;  %1258 = vmatpush.bf16.msra.mxu3 %v1249_v19  ;;  %v1245_v48 = vld [vmem:[#allocation7 + $0x18] sm:$0xff] }
  0x17   :  { %202 = vmatpush.bf16.msra.mxu0 %v1239_v2  ;;  %1252 = vmatpush.bf16.msra.mxu2 %v1239_v2 }
  0x1a   :  { %1030 = vmatpush.bf16.msra.mxu1 %v1248_v22  ;;  %1259 = vmatpush.bf16.msra.mxu3 %v1248_v22 }
  0x1b   :  { %203 = vmatpush.bf16.msra.mxu0 %v1238_v3  ;;  %1253 = vmatpush.bf16.msra.mxu2 %v1238_v3 }
  0x1e   :  { %1031 = vmatpush.bf16.msra.mxu1 %v1247_v30  ;;  %1260 = vmatpush.bf16.msra.mxu3 %v1247_v30 }
  0x1f   :  { %204 = vmatpush.bf16.msra.mxu0 %v1237_v4  ;;  %1254 = vmatpush.bf16.msra.mxu2 %v1237_v4  ;;  %v1243_v4 = vld [vmem:[#allocation7 + $0x8] sm:$0xff] }
  0x22   :  { %1032 = vmatpush.bf16.msra.mxu1 %v1246_v38  ;;  %1261 = vmatpush.bf16.msra.mxu3 %v1246_v38 }
  0x23   :  { %205 = vmatpush.bf16.msra.mxu0 %v1236_v5  ;;  %1255 = vmatpush.bf16.msra.mxu2 %v1236_v5 }
  0x26   :  { %1033 = vmatpush.bf16.msra.mxu1 %v1245_v48  ;;  %1262 = vmatpush.bf16.msra.mxu3 %v1245_v48 }
  0x27   :  { %206 = vmatpush.bf16.msra.mxu0 %v1235_v6  ;;  %1256 = vmatpush.bf16.msra.mxu2 %v1235_v6 }
  0x2a   :  { %1034 = vmatpush.bf16.msra.mxu1 %v1244_v57  ;;  %1263 = vmatpush.bf16.msra.mxu3 %v1244_v57 }
  0x2b   :  { %207 = vmatpush.bf16.msra.mxu0 %v1234_v7  ;;  %1257 = vmatpush.bf16.msra.mxu2 %v1234_v7 }
  0x2e   :  { %208 = vmatmul.bf16.vlgmr.msra.gmra.mxu0 %v1226_v8  ;;  %228 = vmatmul.bf16.vlgmr.msra.gmra.mxu2 %v1230_v9 }
  0x2f   :  { %1035 = vmatpush.bf16.msra.mxu1 %v1243_v4  ;;  %1264 = vmatpush.bf16.msra.mxu3 %v1243_v4 }
  0x3e   :  { %213 = vmatmul.bf16.gmra.mxu0 %v1227_v10  ;;  %233 = vmatmul.bf16.gmra.mxu2 %v1231_v11 }
  0x4e   :  { %218 = vmatmul.bf16.gmra.mxu0 %v1228_v12  ;;  %238 = vmatmul.bf16.gmra.mxu2 %v1232_v13 }
  0x5e   :  { %223 = vmatmul.bf16.gmra.mxu0 %v1229_v14  ;;  %243 = vmatmul.bf16.gmra.mxu2 %v1233_v15  ;;  %v1242_v14 = vld [vmem:[#allocation7] sm:$0xff] }
  0x5f   :  { %1036 = vmatpush.bf16.msra.mxu1 %v1242_v14  ;;  %1265 = vmatpush.bf16.msra.mxu3 %v1242_v14 }
  0xab   :  { %v209_v17 = vpop.f32.mrf.mxu0 }
  0xac   :  { %v1463_v18 = vadd.f32 %v1460_v16, %v209_v17 }
  0xae   :  { %v1466_v20 = vmul.f32 0.70710677, %v1463_v18 }
  0xb0   :  { %v281_v21 = vmul.f32 %v1466_v20, %v1466_v20 }
  0xb1   :  { %v229_v23 = vpop.f32.mrf.mxu2 }
  0xb2   :  { %v1470_v24 = vmin.f32 %v281_v21, 16.0  ;;  %v1473_v25 = vadd.f32 %v1460_v16, %v229_v23 }
  0xb3   :  { %v211_v26 = vpop.f32.mrf.mxu0 }
  0xb4   :  { %v283_v27 = vmul.f32 2.1237322e-06, %v1470_v24  ;;  %v1477_v28 = vmul.f32 0.70710677, %v1473_v25  ;;  %v1480_v29 = vadd.f32 %v1460_v16, %v211_v26  ;;  %v294_v36 = vmul.f32 3.8918573e-05, %v1470_v24 }
  0xb6   :  { %v601_v31 = vmul.f32 %v1477_v28, %v1477_v28  ;;  %v1485_v32 = vmul.f32 0.70710677, %v1480_v29  ;;  %v284_v33 = vadd.f32 0.00028619796, %v283_v27  ;;  %v295_v45 = vadd.f32 0.001143296, %v294_v36 }
  0xb7   :  { %v1554_v36 = vmul.f32 0.5, %v1463_v18  ;;  %v1567_v48 = vmul.f32 0.5, %v1480_v29 }
  0xb8   :  { %v1487_v34 = vmin.f32 %v601_v31, 16.0  ;;  %v321_v35 = vmul.f32 %v1485_v32, %v1485_v32  ;;  %v285_v41 = vmul.f32 %v284_v33, %v1470_v24  ;;  %v296_v53 = vmul.f32 %v295_v45, %v1470_v24 }
  0xb9   :  { %v231_v37 = vpop.f32.mrf.mxu2 }
  0xba   :  { %v1492_v39 = vmin.f32 %v321_v35, 16.0  ;;  %v1495_v40 = vadd.f32 %v1460_v16, %v231_v37  ;;  %v603_v42 = vmul.f32 2.1237322e-06, %v1487_v34  ;;  %v286_v49 = vadd.f32 0.0036580483, %v285_v41 }
  0xbb   :  { %v214_v43 = vpop.f32.mrf.mxu0  ;;  %v297_v63 = vadd.f32 0.014752088, %v296_v53  ;;  %v1557_v37 = vmul.f32 0.5, %v1473_v25 }
  0xbc   :  { %v323_v44 = vmul.f32 2.1237322e-06, %v1492_v39  ;;  %v1501_v46 = vmul.f32 0.70710677, %v1495_v40  ;;  %v1504_v47 = vadd.f32 %v1460_v16, %v214_v43  ;;  %v604_v50 = vadd.f32 0.00028619796, %v603_v42 }
  0xbd   :  { %v287_v59 = vmul.f32 %v286_v49, %v1470_v24  ;;  %v298_v10 = vmul.f32 %v297_v63, %v1470_v24 }
  0xbe   :  { %v1507_v51 = vmul.f32 0.70710677, %v1504_v47  ;;  %v324_v52 = vadd.f32 0.00028619796, %v323_v44  ;;  %v641_v54 = vmul.f32 %v1501_v46, %v1501_v46  ;;  %v605_v60 = vmul.f32 %v604_v50, %v1487_v34 }
  0xbf   :  { %v288_v5 = vadd.f32 0.05243302, %v287_v59  ;;  %v299_v30 = vadd.f32 0.112945676, %v298_v10  ;;  %v1574_v50 = vmul.f32 0.5, %v1495_v40 }
  0xc0   :  { %v361_v55 = vmul.f32 %v1507_v51, %v1507_v51  ;;  %v325_v62 = vmul.f32 %v324_v52, %v1492_v39  ;;  %v1520_v0 = vmin.f32 %v641_v54, 16.0  ;;  %v606_v6 = vadd.f32 0.0036580483, %v605_v60 }
  0xc1   :  { %v234_v56 = vpop.f32.mrf.mxu2  ;;  %v289_v21 = vmul.f32 %v288_v5, %v1470_v24  ;;  %v300_v25 = vmul.f32 %v299_v30, %v1470_v24 }
  0xc2   :  { %v1515_v58 = vadd.f32 %v1460_v16, %v234_v56  ;;  %v1522_v1 = vmin.f32 %v361_v55, 16.0  ;;  %v326_v8 = vadd.f32 0.0036580483, %v325_v62  ;;  %v643_v11 = vmul.f32 2.1237322e-06, %v1520_v0 }
  0xc3   :  { %v216_v61 = vpop.f32.mrf.mxu0  ;;  %v607_v22 = vmul.f32 %v606_v6, %v1487_v34  ;;  %v290_v42 = vadd.f32 0.18741608, %v289_v21  ;;  %v1581_v56 = vmul.f32 0.5, %v1504_v47  ;;  %v301_v6 = vadd.f32 0.4994258, %v300_v25 }
  0xc4   :  { %v1525_v2 = vmul.f32 0.70710677, %v1515_v58  ;;  %v1528_v3 = vadd.f32 %v1460_v16, %v216_v61  ;;  %v363_v12 = vmul.f32 2.1237322e-06, %v1522_v1  ;;  %v327_v26 = vmul.f32 %v326_v8, %v1492_v39 }
  0xc5   :  { %v644_v31 = vadd.f32 0.00028619796, %v643_v11  ;;  %v608_v43 = vadd.f32 0.05243302, %v607_v22  ;;  %v291_v40 = vmul.f32 %v290_v42, %v1470_v24  ;;  %v1605_v22 = vmul.f32 0.5, %v1515_v58 }
  0xc6   :  { %v681_v7 = vmul.f32 %v1525_v2, %v1525_v2  ;;  %v1533_v9 = vmul.f32 0.70710677, %v1528_v3  ;;  %v364_v33 = vadd.f32 0.00028619796, %v363_v12  ;;  %v328_v18 = vadd.f32 0.05243302, %v327_v26 }
  0xc7   :  { %v645_v52 = vmul.f32 %v644_v31, %v1520_v0  ;;  %v609_v60 = vmul.f32 %v608_v43, %v1487_v34  ;;  %2140 = vst [vmem:[#allocation12_spill] sm:$0xff] %v1605_v22 }
  0xc8   :  { %v1538_v15 = vmin.f32 %v681_v7, 16.0  ;;  %v401_v17 = vmul.f32 %v1533_v9, %v1533_v9  ;;  %v365_v53 = vmul.f32 %v364_v33, %v1522_v1  ;;  %v329_v4 = vmul.f32 %v328_v18, %v1492_v39 }
  0xc9   :  { %v236_v13 = vpop.f32.mrf.mxu2  ;;  %v646_v7 = vadd.f32 0.0036580483, %v645_v52  ;;  %v610_v21 = vadd.f32 0.18741608, %v609_v60 }
  0xca   :  { %v1543_v19 = vadd.f32 %v1460_v16, %v236_v13  ;;  %v1548_v27 = vmin.f32 %v401_v17, 16.0  ;;  %v683_v38 = vmul.f32 2.1237322e-06, %v1538_v15  ;;  %v366_v8 = vadd.f32 0.0036580483, %v365_v53 }
  0xcb   :  { %v219_v23 = vpop.f32.mrf.mxu0  ;;  %v292_v17 = vadd.f32 1.1283791, %v291_v40  ;;  %v330_v26 = vadd.f32 0.18741608, %v329_v4  ;;  %v611_v53 = vmul.f32 %v610_v21, %v1487_v34 }
  0xcc   :  { %v1551_v35 = vmul.f32 0.70710677, %v1543_v19  ;;  %v1561_v41 = vadd.f32 %v1460_v16, %v219_v23  ;;  %v403_v44 = vmul.f32 2.1237322e-06, %v1548_v27  ;;  %v684_v29 = vadd.f32 0.00028619796, %v683_v38 }
  0xcd   :  { %v647_v38 = vmul.f32 %v646_v7, %v1520_v0  ;;  %v367_v42 = vmul.f32 %v366_v8, %v1522_v1  ;;  %v1643_v21 = vmul.f32 0.5, %v1543_v19 }
  0xce   :  { %v721_v45 = vmul.f32 %v1551_v35, %v1551_v35  ;;  %v1570_v49 = vmul.f32 0.70710677, %v1561_v41  ;;  %v404_v61 = vadd.f32 0.00028619796, %v403_v44  ;;  %v685_v11 = vmul.f32 %v684_v29, %v1538_v15 }
  0xcf   :  { %2142 = vst [vmem:[#allocation14_spill] sm:$0xff] %v1643_v21 }
  0xd0   :  { %v1578_v54 = vmin.f32 %v721_v45, 16.0  ;;  %v441_v57 = vmul.f32 %v1570_v49, %v1570_v49  ;;  %v405_v23 = vmul.f32 %v404_v61, %v1548_v27  ;;  %v302_v45 = vmul.f32 %v301_v6, %v1470_v24 }
  0xd1   :  { %v239_v55 = vpop.f32.mrf.mxu2  ;;  %v686_v58 = vadd.f32 0.0036580483, %v685_v11  ;;  %v331_v24 = vmul.f32 %v330_v26, %v1492_v39 }
  0xd2   :  { %v1586_v59 = vadd.f32 %v1460_v16, %v239_v55  ;;  %v723_v62 = vmul.f32 2.1237322e-06, %v1578_v54  ;;  %v1592_v5 = vmin.f32 %v441_v57, 16.0  ;;  %v1624_v55 = vmul.f32 0.5, %v1528_v3 }
  0xd3   :  { %v221_v63 = vpop.f32.mrf.mxu0  ;;  %v406_v29 = vadd.f32 0.0036580483, %v405_v23  ;;  %v1634_v7 = vadd.f32 1.0, %v302_v45  ;;  %v368_v3 = vadd.f32 0.05243302, %v367_v42  ;;  %v687_v8 = vmul.f32 %v686_v58, %v1538_v15 }
  0xd4   :  { %v1595_v47 = vmul.f32 0.70710677, %v1586_v59  ;;  %v724_v10 = vadd.f32 0.00028619796, %v723_v62  ;;  %v443_v12 = vmul.f32 2.1237322e-06, %v1592_v5  ;;  %v1602_v14 = vadd.f32 %v1460_v16, %v221_v63 }
  0xd5   :  { %v648_v63 = vadd.f32 0.05243302, %v647_v38  ;;  %v332_v26 = vadd.f32 1.1283791, %v331_v24  ;;  %1276 = vrcp.f32 %v1634_v7  ;;  %vm309_vm1 = vweird.f32 %v1634_v7 }
  0xd6   :  { %v761_v13 = vmul.f32 %v1595_v47, %v1595_v47  ;;  %v725_v30 = vmul.f32 %v724_v10, %v1578_v54  ;;  %v444_v31 = vadd.f32 0.00028619796, %v443_v12  ;;  %v1614_v43 = vmul.f32 0.70710677, %v1602_v14 }
  0xd7   :  { %v612_v12 = vadd.f32 1.1283791, %v611_v53  ;;  %v649_v19 = vmul.f32 %v648_v63, %v1520_v0 }
  0xd8   :  { %v1609_v33 = vmin.f32 %v761_v13, 16.0  ;;  %v445_v18 = vmul.f32 %v444_v31, %v1592_v5  ;;  %v481_v57 = vmul.f32 %v1614_v43, %v1614_v43  ;;  %v726_v60 = vadd.f32 0.0036580483, %v725_v30 }
  0xd9   :  { %v241_v44 = vpop.f32.mrf.mxu2  ;;  %v407_v13 = vmul.f32 %v406_v29, %v1548_v27 }
  0xda   :  { %v763_v25 = vmul.f32 2.1237322e-06, %v1609_v33  ;;  %v1620_v52 = vadd.f32 %v1460_v16, %v241_v44  ;;  %v446_v61 = vadd.f32 0.0036580483, %v445_v18  ;;  %v1629_v4 = vmin.f32 %v481_v57, 16.0 }
  0xdb   :  { %v224_v40 = vpop.f32.mrf.mxu0  ;;  %v727_v30 = vmul.f32 %v726_v60, %v1578_v54  ;;  %v369_v18 = vmul.f32 %v368_v3, %v1522_v1  ;;  %v408_v29 = vadd.f32 0.05243302, %v407_v13 }
  0xdc   :  { %v764_v62 = vadd.f32 0.00028619796, %v763_v25  ;;  %v1632_v6 = vadd.f32 %v1460_v16, %v224_v40  ;;  %v1639_v11 = vmul.f32 0.70710677, %v1620_v52  ;;  %v483_v23 = vmul.f32 2.1237322e-06, %v1629_v4 }
  0xdd   :  { %v447_v31 = vmul.f32 %v446_v61, %v1592_v5  ;;  %v688_v25 = vadd.f32 0.05243302, %v687_v8  ;;  %v1665_v61 = vmul.f32 %v292_v17, %v1466_v20  ;;  %v1680_v17 = vpop.eup %1276 }
  0xde   :  { %2141 = vst [vmem:[#allocation13_spill] sm:$0xff] %v1632_v6  ;;  %v765_v10 = vmul.f32 %v764_v62, %v1609_v33  ;;  %v801_v38 = vmul.f32 %v1639_v11, %v1639_v11  ;;  %v484_v44 = vadd.f32 0.00028619796, %v483_v23  ;;  %v1651_v45 = vmul.f32 0.70710677, %v1632_v6 }
  0xdf   :  { %v728_v62 = vadd.f32 0.05243302, %v727_v30  ;;  %v448_v63 = vadd.f32 0.05243302, %v447_v31  ;;  %v370_v30 = vadd.f32 0.18741608, %v369_v18  ;;  %v689_v31 = vmul.f32 %v688_v25, %v1538_v15 }
  0xe0   :  { %v766_v42 = vadd.f32 0.0036580483, %v765_v10  ;;  %2143 = vst [vmem:[#allocation15_spill] sm:$0xff] %v1651_v45  ;;  %v1656_v53 = vmin.f32 %v801_v38, 16.0  ;;  %v485_v57 = vmul.f32 %v484_v44, %v1629_v4  ;;  %v521_v40 = vmul.f32 %v1651_v45, %v1651_v45 }
  0xe1   :  { %v244_v58 = vpop.f32.mrf.mxu2  ;;  %v1675_v38 = vmul.f32 %v612_v12, %v1477_v28  ;;  %v650_v44 = vadd.f32 0.18741608, %v649_v19  ;;  %v449_v19 = vmul.f32 %v448_v63, %v1592_v5  ;;  %vm310_vm0 = vweird.f32 %v1680_v17 }
  0xe2   :  { %v1662_v24 = vadd.f32 %v1460_v16, %v244_v58  ;;  %v803_v3 = vmul.f32 2.1237322e-06, %v1656_v53  ;;  %v767_v8 = vmul.f32 %v766_v42, %v1609_v33  ;;  %v486_v10 = vadd.f32 0.0036580483, %v485_v57  ;;  %vm1767_vm2 = vmor %vm309_vm1, %vm310_vm0 }
  0xe3   :  { %v226_v60 = vpop.f32.mrf.mxu0  ;;  %v1669_v13 = vmin.f32 %v521_v40, 16.0  ;;  %v409_v40 = vmul.f32 %v408_v29, %v1548_v27  ;;  %v305_v29 = vmul.f32 %v1680_v17, %v1634_v7  ;;  %v450_v22 = vadd.f32 0.18741608, %v449_v19 }
  0xe4   :  { %2144 = vst [vmem:[#allocation16_spill] sm:$0xff] %v1662_v24  ;;  %v1672_v23 = vadd.f32 %v1460_v16, %v226_v60  ;;  %v804_v58 = vadd.f32 0.00028619796, %v803_v3  ;;  %v1678_v20 = vmul.f32 0.70710677, %v1662_v24  ;;  %v487_v42 = vmul.f32 %v486_v10, %v1629_v4 }
  0xe5   :  { %v523_v57 = vmul.f32 2.1237322e-06, %v1669_v13  ;;  %v729_v60 = vmul.f32 %v728_v62, %v1578_v54  ;;  %v768_v3 = vadd.f32 0.05243302, %v767_v8  ;;  %v651_v62 = vmul.f32 %v650_v44, %v1520_v0 }
  0xe6   :  { %2145 = vst [vmem:[#allocation17_spill] sm:$0xff] %v1672_v23  ;;  %v805_v28 = vmul.f32 %v804_v58, %v1656_v53  ;;  %v841_v12 = vmul.f32 %v1678_v20, %v1678_v20  ;;  %v1692_v18 = vmul.f32 0.70710677, %v1672_v23  ;;  %v488_v25 = vadd.f32 0.05243302, %v487_v42 }
  0xe7   :  { %2146 = vst [vmem:[#allocation18_spill] sm:$0xff] %v1678_v20  ;;  %v524_v24 = vadd.f32 0.00028619796, %v523_v57  ;;  %v371_v58 = vmul.f32 %v370_v30, %v1522_v1  ;;  %v1704_v8 = vmul.f32 %v332_v26, %v1485_v32  ;;  %v690_v42 = vadd.f32 0.18741608, %v689_v31 }
  0xe8   :  { %2147 = vst [vmem:[#allocation19_spill] sm:$0xff] %v1692_v18  ;;  %v806_v10 = vadd.f32 0.0036580483, %v805_v28  ;;  %v1694_v6 = vmin.f32 %v841_v12, 16.0  ;;  %v561_v63 = vmul.f32 %v1692_v18, %v1692_v18  ;;  %v410_v12 = vadd.f32 0.18741608, %v409_v40 }
  0xe9   :  { %v246_v21 = vpop.f32.mrf.mxu2  ;;  %v525_v20 = vmul.f32 %v524_v24, %v1669_v13  ;;  %v730_v23 = vadd.f32 0.18741608, %v729_v60  ;;  %v769_v30 = vmul.f32 %v768_v3, %v1609_v33  ;;  %v489_v24 = vmul.f32 %v488_v25, %v1629_v4 }
  0xea   :  { %v807_v57 = vmul.f32 %v806_v10, %v1656_v53  ;;  %v843_v28 = vmul.f32 2.1237322e-06, %v1694_v6  ;;  %v1709_v44 = vadd.f32 %v1460_v16, %v246_v21  ;;  %v1713_v18 = vmin.f32 %v561_v63, 16.0 }
  0xeb   :  { %v526_v45 = vadd.f32 0.0036580483, %v525_v20  ;;  %v652_v32 = vadd.f32 1.1283791, %v651_v62  ;;  %v372_v26 = vadd.f32 1.1283791, %v371_v58  ;;  %v691_v40 = vmul.f32 %v690_v42, %v1538_v15 }
  0xec   :  { %2148 = vst [vmem:[#allocation20_spill] sm:$0xff] %v1709_v44  ;;  %v1716_v31 = vmul.f32 0.5, %v1561_v41  ;;  %v306_v10 = vsub.f32 1.0, %v305_v29  ;;  %v1720_v60 = vmul.f32 0.5, %v1586_v59  ;;  %v808_v16 = vadd.f32 0.05243302, %v807_v57 }
  0xed   :  { %v844_v21 = vadd.f32 0.00028619796, %v843_v28  ;;  %v411_v19 = vmul.f32 %v410_v12, %v1548_v27  ;;  %v731_v3 = vmul.f32 %v730_v23, %v1578_v54  ;;  %v451_v20 = vmul.f32 %v450_v22, %v1592_v5 }
  0xee   :  { %2149 = vst [vmem:[#allocation21_spill] sm:$0xff] %v1720_v60  ;;  %v1726_v25 = vmul.f32 0.70710677, %v1709_v44  ;;  %v770_v62 = vadd.f32 0.18741608, %v769_v30  ;;  %v527_v29 = vmul.f32 %v526_v45, %v1669_v13  ;;  %v1731_v59 = vmul.f32 %v652_v32, %v1501_v46 }
  0xef   :  { %v490_v41 = vadd.f32 0.18741608, %v489_v24  ;;  %v563_v58 = vmul.f32 2.1237322e-06, %v1713_v18  ;;  %v1734_v63 = vmul.f32 %v372_v26, %v1507_v51  ;;  %v1737_v42 = vmul.f32 0.5, %v1602_v14 }
  0xf0   :  { %2150 = vst [vmem:[#allocation22_spill] sm:$0xff] %v1726_v25  ;;  %v307_v22 = vmul.f32 %v1680_v17, %v306_v10  ;;  %v692_v23 = vadd.f32 1.1283791, %v691_v40  ;;  %v809_v57 = vmul.f32 %v808_v16, %v1656_v53  ;;  %v845_v28 = vmul.f32 %v844_v21, %v1694_v6 }
  0xf1   :  { %2151 = vst [vmem:[#allocation23_spill] sm:$0xff] %v1737_v42  ;;  %v334_v45 = vmul.f32 3.8918573e-05, %v1492_v39  ;;  %v412_v12 = vadd.f32 1.1283791, %v411_v19  ;;  %v881_v46 = vmul.f32 %v1726_v25, %v1726_v25  ;;  %v771_v51 = vmul.f32 %v770_v62, %v1609_v33 }
  0xf2   :  { %v732_v30 = vadd.f32 1.1283791, %v731_v3  ;;  %v1743_v24 = vadd.f32 1.1283791, %v451_v20  ;;  %v491_v14 = vmul.f32 %v490_v41, %v1629_v4  ;;  %v528_v32 = vadd.f32 0.05243302, %v527_v29 }
  0xf3   :  { %v564_v26 = vadd.f32 0.00028619796, %v563_v58  ;;  %v308_v10 = vadd.f32 %v1680_v17, %v307_v22  ;;  %v313_v40 = vand.u32 2147483647, %v1634_v7  ;;  %v335_v16 = vadd.f32 0.001143296, %v334_v45 }
  0xf4   :  { %v1753_v21 = vmul.f32 0.5, %v1620_v52  ;;  %v810_v19 = vadd.f32 0.18741608, %v809_v57  ;;  %v846_v3 = vadd.f32 0.0036580483, %v845_v28  ;;  %v315_v20 = vand.u32 2147483648, %v1634_v7 }
  0xf5   :  { %v1756_v44 = vmin.f32 %v881_v46, 16.0  ;;  %v336_v62 = vmul.f32 %v335_v16, %v1492_v39  ;;  %v614_v41 = vmul.f32 3.8918573e-05, %v1487_v34  ;;  %v772_v29 = vadd.f32 1.1283791, %v771_v51 }
  0xf6   :  { %2152 = vst [vmem:[#allocation24_spill] sm:$0xff] %v1753_v21  ;;  %v1761_v58 = vadd.f32 1.1283791, %v491_v14  ;;  %v529_v22 = vmul.f32 %v528_v32, %v1669_v13  ;;  %v565_v52 = vmul.f32 %v564_v26, %v1713_v18  ;;  %v312_v7 = vsel %vm1767_vm2, %v1680_v17, %v308_v10 }
  0xf7   :  { %vm314_vm3 = vcmp.eq.f32.partialorder %v313_v40, 8.507059e+37  ;;  %v337_v28 = vadd.f32 0.014752088, %v336_v62  ;;  %v615_v45 = vadd.f32 0.001143296, %v614_v41  ;;  %v811_v46 = vmul.f32 %v810_v19, %v1656_v53 }
  0xf8   :  { %v847_v51 = vmul.f32 %v846_v3, %v1694_v6  ;;  %v316_v14 = vor.u32 1.1754944e-38, %v315_v20  ;;  %v654_v32 = vmul.f32 3.8918573e-05, %v1520_v0  ;;  %v883_v26 = vmul.f32 2.1237322e-06, %v1756_v44 }
  0xf9   :  { %v338_v16 = vmul.f32 %v337_v28, %v1492_v39  ;;  %v616_v25 = vmul.f32 %v615_v45, %v1487_v34  ;;  %v374_v21 = vmul.f32 3.8918573e-05, %v1522_v1  ;;  %v530_v57 = vadd.f32 0.18741608, %v529_v22 }
  0xfa   :  { %v566_v17 = vadd.f32 0.0036580483, %v565_v52  ;;  %v317_v10 = vsel %vm314_vm3, %v316_v14, %v312_v7  ;;  %v655_v40 = vadd.f32 0.001143296, %v654_v32  ;;  %v1782_v62 = vmul.f32 %v692_v23, %v1525_v2 }
  0xfb   :  { %v339_v19 = vadd.f32 0.112945676, %v338_v16  ;;  %v617_v3 = vadd.f32 0.014752088, %v616_v25  ;;  %v375_v20 = vadd.f32 0.001143296, %v374_v21  ;;  %v318_v42 = vmul.f32 %v317_v10, %v1665_v61 }
  0xfc   :  { %v1784_v41 = vadd.f32 1.1283791, %v811_v46  ;;  %v1786_v60 = vadd.f32 0.05243302, %v847_v51  ;;  %v656_v28 = vmul.f32 %v655_v40, %v1520_v0  ;;  %v414_v45 = vmul.f32 3.8918573e-05, %v1548_v27 }
  0xfd   :  { %v340_v22 = vmul.f32 %v339_v19, %v1492_v39  ;;  %v618_v52 = vmul.f32 %v617_v3, %v1487_v34  ;;  %v376_v2 = vmul.f32 %v375_v20, %v1522_v1  ;;  %v1795_v23 = vmul.f32 %v412_v12, %v1533_v9 }
  0xfe   :  { %2155 = vst [vmem:[#allocation25_spill] sm:$0xff] %v1786_v60  ;;  %v884_v25 = vadd.f32 0.00028619796, %v883_v26  ;;  %v657_v21 = vadd.f32 0.014752088, %v656_v28  ;;  %v1798_v46 = vmul.f32 %v732_v30, %v1551_v35  ;;  %v567_v61 = vmul.f32 %v566_v17, %v1713_v18 }
  0xff   :  { %v415_v7 = vadd.f32 0.001143296, %v414_v45  ;;  %v341_v51 = vadd.f32 0.4994258, %v340_v22  ;;  %v619_v14 = vadd.f32 0.112945676, %v618_v52  ;;  %v1809_v35 = vmul.f32 %v1743_v24, %v1570_v49 }
 0x100   :  { %v377_v32 = vadd.f32 0.014752088, %v376_v2  ;;  %v658_v16 = vmul.f32 %v657_v21, %v1520_v0  ;;  %v694_v40 = vmul.f32 3.8918573e-05, %v1538_v15  ;;  %v1178_v19 = vclamps-f32 %v318_v42, 1.0 }
 0x101   :  { %v416_v10 = vmul.f32 %v415_v7, %v1548_v27  ;;  %v342_v9 = vmul.f32 %v341_v51, %v1492_v39  ;;  %v620_v12 = vmul.f32 %v619_v14, %v1487_v34  ;;  %v734_v17 = vmul.f32 3.8918573e-05, %v1578_v54 }
 0x102   :  { %v378_v26 = vmul.f32 %v377_v32, %v1522_v1  ;;  %v659_v30 = vadd.f32 0.112945676, %v658_v16  ;;  %v1813_v20 = vmul.f32 %v772_v29, %v1595_v47  ;;  %v531_v39 = vmul.f32 %v530_v57, %v1669_v13 }
 0x103   :  { %v417_v3 = vadd.f32 0.014752088, %v416_v10  ;;  %v1815_v28 = vadd.f32 1.0, %v342_v9  ;;  %v621_v42 = vadd.f32 0.4994258, %v620_v12  ;;  %v885_v24 = vmul.f32 %v884_v25, %v1756_v44 }
 0x104   :  { %v379_v45 = vadd.f32 0.112945676, %v378_v26  ;;  %v660_v22 = vmul.f32 %v659_v30, %v1520_v0  ;;  %v695_v2 = vadd.f32 0.001143296, %v694_v40  ;;  %v568_v49 = vadd.f32 0.05243302, %v567_v61 }
 0x105   :  { %v418_v52 = vmul.f32 %v417_v3, %v1548_v27  ;;  %1278 = vrcp.f32 %v1815_v28  ;;  %v921_v21 = vadd.f32 1.0, %v1178_v19  ;;  %v622_v47 = vmul.f32 %v621_v42, %v1487_v34 }
 0x106   :  { %v661_v29 = vadd.f32 0.4994258, %v660_v22  ;;  %v380_v7 = vmul.f32 %v379_v45, %v1522_v1  ;;  %v353_v14 = vand.u32 2147483647, %v1815_v28  ;;  %v355_v57 = vand.u32 2147483648, %v1815_v28 }
 0x107   :  { %v419_v51 = vadd.f32 0.112945676, %v418_v52  ;;  %v696_v32 = vmul.f32 %v695_v2, %v1538_v15  ;;  %v735_v16 = vadd.f32 0.001143296, %v734_v17  ;;  %v1827_v10 = vadd.f32 1.0, %v622_v47 }
 0x108   :  { %v662_v25 = vmul.f32 %v661_v29, %v1520_v0  ;;  %v381_v61 = vadd.f32 0.4994258, %v380_v7  ;;  %v1833_v34 = vmul.f32 %v1761_v58, %v1614_v43  ;;  %v1835_v19 = vadd.f32 1.1283791, %v531_v39 }
 0x109   :  { %v420_v40 = vmul.f32 %v419_v51, %v1548_v27  ;;  %v1837_v9 = vadd.f32 0.0036580483, %v885_v24  ;;  %v697_v12 = vadd.f32 0.014752088, %v696_v32  ;;  %v1840_v26 = vmul.f32 %v568_v49, %v1713_v18 }
 0x10a   :  { %v1843_v30 = vmul.f32 %v921_v21, %v1554_v36  ;;  %1280 = vrcp.f32 %v1827_v10  ;;  %v736_v0 = vmul.f32 %v735_v16, %v1578_v54  ;;  %v1847_v17 = vadd.f32 1.0, %v662_v25 }
 0x10b   :  { %v1279_v3 = vpop.eup %1278  ;;  %v382_v43 = vmul.f32 %v381_v61, %v1522_v1  ;;  %v421_v58 = vadd.f32 0.4994258, %v420_v40  ;;  %v698_v42 = vmul.f32 %v697_v12, %v1538_v15  ;;  %vm349_vm4 = vweird.f32 %v1815_v28 }
 0x10c   :  { %v345_v45 = vmul.f32 %v1279_v3, %v1815_v28  ;;  %vm1853_vm5 = vcmp.eq.f32.partialorder %v353_v14, 8.507059e+37  ;;  %v356_v36 = vor.u32 1.1754944e-38, %v355_v57  ;;  %v633_v22 = vand.u32 2147483647, %v1827_v10 }
 0x10d   :  { %v635_v52 = vand.u32 2147483648, %v1827_v10  ;;  %1282 = vrcp.f32 %v1847_v17  ;;  %v454_v1 = vmul.f32 3.8918573e-05, %v1592_v5  ;;  %v1861_v49 = vadd.f32 1.0, %v382_v43 }
 0x10e   :  { %v346_v2 = vsub.f32 1.0, %v345_v45  ;;  %v422_v24 = vmul.f32 %v421_v58, %v1548_v27  ;;  %v699_v21 = vadd.f32 0.112945676, %v698_v42  ;;  %vm350_vm6 = vweird.f32 %v1279_v3 }
 0x10f   :  { %vm629_vm7 = vweird.f32 %v1827_v10  ;;  %v737_v47 = vadd.f32 0.014752088, %v736_v0  ;;  %v1866_v29 = vmul.f32 3.8918573e-05, %v1629_v4  ;;  %v673_v14 = vand.u32 2147483647, %v1847_v17  ;;  %vm351_vm10 = vmor %vm349_vm4, %vm350_vm6 }
 0x110   :  { %v1281_v7 = vpop.eup %1280  ;;  %v347_v51 = vmul.f32 %v1279_v3, %v346_v2  ;;  %v675_v57 = vand.u32 2147483648, %v1847_v17  ;;  %1284 = vrcp.f32 %v1861_v49  ;;  %vm1872_vm8 = vcmp.eq.f32.partialorder %v633_v22, 8.507059e+37 }
 0x111   :  { %v625_v32 = vmul.f32 %v1281_v7, %v1827_v10  ;;  %v636_v16 = vor.u32 1.1754944e-38, %v635_v52  ;;  %v1876_v25 = vadd.f32 1.0, %v422_v24  ;;  %vm669_vm9 = vweird.f32 %v1847_v17 }
 0x112   :  { %v348_v61 = vadd.f32 %v1279_v3, %v347_v51  ;;  %v700_v40 = vmul.f32 %v699_v21, %v1538_v15  ;;  %v738_v12 = vmul.f32 %v737_v47, %v1578_v54  ;;  %v393_v58 = vand.u32 2147483647, %v1861_v49 }
 0x113   :  { %v1283_v0 = vpop.eup %1282  ;;  %v626_v43 = vsub.f32 1.0, %v625_v32  ;;  %v395_v42 = vand.u32 2147483648, %v1861_v49  ;;  %1286 = vrcp.f32 %v1876_v25  ;;  %vm1888_vm11 = vcmp.eq.f32.partialorder %v673_v14, 8.507059e+37 }
 0x114   :  { %v352_v45 = vsel %vm351_vm10, %v1279_v3, %v348_v61  ;;  %v665_v22 = vmul.f32 %v1283_v0, %v1847_v17  ;;  %v676_v2 = vor.u32 1.1754944e-38, %v675_v57  ;;  %v455_v24 = vadd.f32 0.001143296, %v454_v1 }
 0x115   :  { %v357_v28 = vsel %vm1853_vm5, %v356_v36, %v352_v45  ;;  %v627_v21 = vmul.f32 %v1281_v7, %v626_v43  ;;  %vm630_vm12 = vweird.f32 %v1281_v7  ;;  %vm389_vm13 = vweird.f32 %v1861_v49 }
 0x116   :  { %v701_v47 = vadd.f32 0.4994258, %v700_v40  ;;  %v1285_v51 = vpop.eup %1284  ;;  %v358_v32 = vmul.f32 %v357_v28, %v1704_v8  ;;  %v666_v3 = vsub.f32 1.0, %v665_v22  ;;  %v433_v61 = vand.u32 2147483647, %v1876_v25  ;;  %vm631_vm0 = vmor %vm629_vm7, %vm630_vm12 }
 0x117   :  { %v739_v14 = vadd.f32 0.112945676, %v738_v12  ;;  %v628_v60 = vadd.f32 %v1281_v7, %v627_v21  ;;  %vm670_vm14 = vweird.f32 %v1283_v0  ;;  %v385_v57 = vmul.f32 %v1285_v51, %v1861_v49 }
 0x118   :  { %vm1898_vm15 = vcmp.eq.f32.partialorder %v393_v58, 8.507059e+37  ;;  %v396_v39 = vor.u32 1.1754944e-38, %v395_v42  ;;  %v1179_v36 = vclamps-f32 %v358_v32, 1.0  ;;  %v667_v40 = vmul.f32 %v1283_v0, %v666_v3  ;;  %vm671_vm3 = vmor %vm669_vm9, %vm670_vm14 }
 0x119   :  { %v702_v8 = vmul.f32 %v701_v47, %v1538_v15  ;;  %v740_v43 = vmul.f32 %v739_v14, %v1578_v54  ;;  %v1287_v45 = vpop.eup %1286  ;;  %v632_v12 = vsel %vm631_vm0, %v1281_v7, %v628_v60  ;;  %v386_v22 = vsub.f32 1.0, %v385_v57 }
 0x11a   :  { %vm429_vm1 = vweird.f32 %v1876_v25  ;;  %v435_v58 = vand.u32 2147483648, %v1876_v25  ;;  %v922_v28 = vadd.f32 1.0, %v1179_v36  ;;  %v637_v42 = vsel %vm1872_vm8, %v636_v16, %v632_v12 }
 0x11b   :  { %v668_v21 = vadd.f32 %v1283_v0, %v667_v40  ;;  %v425_v10 = vmul.f32 %v1287_v45, %v1876_v25  ;;  %vm1911_vm2 = vcmp.eq.f32.partialorder %v433_v61, 8.507059e+37  ;;  %v638_v15 = vmul.f32 %v637_v42, %v1675_v38 }
 0x11c   :  { %v387_v60 = vmul.f32 %v1285_v51, %v386_v22  ;;  %vm390_vm4 = vweird.f32 %v1285_v51  ;;  %v1919_v7 = vadd.f32 1.0, %v702_v8  ;;  %v938_v27 = vmul.f32 %v922_v28, %v1567_v48 }
 0x11d   :  { %v672_v16 = vsel %vm671_vm3, %v1283_v0, %v668_v21  ;;  %v426_v47 = vsub.f32 1.0, %v425_v10  ;;  %v741_v3 = vadd.f32 0.4994258, %v740_v43  ;;  %v1186_v14 = vclamps-f32 %v638_v15, 1.0  ;;  %vm391_vm5 = vmor %vm389_vm13, %vm390_vm4 }
 0x11e   :  { %v677_v61 = vsel %vm1888_vm11, %v676_v2, %v672_v16  ;;  %v388_v57 = vadd.f32 %v1285_v51, %v387_v60  ;;  %1288 = vrcp.f32 %v1919_v7  ;;  %v953_v38 = vpack.c.bf16 %v938_v27, %v1843_v30 }
 0x11f   :  { %v678_v17 = vmul.f32 %v677_v61, %v1731_v59  ;;  %v427_v36 = vmul.f32 %v1287_v45, %v426_v47  ;;  %vm430_vm6 = vweird.f32 %v1287_v45  ;;  %v929_v48 = vadd.f32 1.0, %v1186_v14 }
 0x120   :  { %v392_v0 = vsel %vm391_vm5, %v1285_v51, %v388_v57  ;;  %v456_v40 = vmul.f32 %v455_v24, %v1592_v5  ;;  %v495_v8 = vadd.f32 0.001143296, %v1866_v29  ;;  %1037 = vmatmul.bf16.vlgmr.msra.gmra.mxu1 %v953_v38  ;;  %v742_v30 = vmul.f32 %v741_v3, %v1578_v54  ;;  %vm431_vm7 = vmor %vm429_vm1, %vm430_vm6 }
 0x121   :  { %v1187_v52 = vclamps-f32 %v678_v17, 1.0  ;;  %v397_v2 = vsel %vm1898_vm15, %v396_v39, %v392_v0  ;;  %v428_v43 = vadd.f32 %v1287_v45, %v427_v36  ;;  %v436_v49 = vor.u32 1.1754944e-38, %v435_v58 }
 0x122   :  { %v398_v59 = vmul.f32 %v397_v2, %v1734_v63  ;;  %v713_v51 = vand.u32 2147483647, %v1919_v7  ;;  %v715_v24 = vand.u32 2147483648, %v1919_v7  ;;  %v945_v29 = vmul.f32 %v929_v48, %v1557_v37 }
 0x123   :  { %v930_v12 = vadd.f32 1.0, %v1187_v52  ;;  %v432_v22 = vsel %vm431_vm7, %v1287_v45, %v428_v43  ;;  %v1940_v28 = vadd.f32 1.0, %v742_v30  ;;  %v457_v63 = vadd.f32 0.014752088, %v456_v40 }
 0x124   :  { %v1289_v1 = vpop.eup %1288  ;;  %v1180_v39 = vclamps-f32 %v398_v59, 1.0  ;;  %v437_v54 = vsel %vm1911_vm2, %v436_v49, %v432_v22  ;;  %v496_v25 = vmul.f32 %v495_v8, %v1629_v4  ;;  %v774_v10 = vmul.f32 3.8918573e-05, %v1609_v33 }
 0x125   :  { %v946_v58 = vmul.f32 %v930_v12, %v1574_v50  ;;  %v438_v42 = vmul.f32 %v437_v54, %v1795_v23  ;;  %v705_v21 = vmul.f32 %v1289_v1, %v1919_v7  ;;  %vm709_vm8 = vweird.f32 %v1919_v7 }
 0x126   :  { %vm1950_vm9 = vcmp.eq.f32.partialorder %v713_v51, 8.507059e+37  ;;  %v716_v45 = vor.u32 1.1754944e-38, %v715_v24  ;;  %1290 = vrcp.f32 %v1940_v28  ;;  %v923_v60 = vadd.f32 1.0, %v1180_v39 }
 0x127   :  { %v957_v32 = vpack.c.bf16 %v946_v58, %v945_v29  ;;  %v1181_v15 = vclamps-f32 %v438_v42, 1.0  ;;  %v706_v27 = vsub.f32 1.0, %v705_v21  ;;  %vm710_vm10 = vweird.f32 %v1289_v1 }
 0x128   :  { %v753_v50 = vand.u32 2147483647, %v1940_v28  ;;  %v458_v23 = vmul.f32 %v457_v63, %v1592_v5  ;;  %v497_v16 = vadd.f32 0.014752088, %v496_v25  ;;  %v755_v14 = vand.u32 2147483648, %v1940_v28  ;;  %vm711_vm11 = vmor %vm709_vm8, %vm710_vm10 }
 0x129   :  { %1057 = vmatmul.bf16.vlgmr.msra.gmra.mxu3 %v957_v32  ;;  %v924_v47 = vadd.f32 1.0, %v1181_v15  ;;  %v707_v3 = vmul.f32 %v1289_v1, %v706_v27  ;;  %v775_v61 = vadd.f32 0.001143296, %v774_v10  ;;  %v814_v17 = vmul.f32 3.8918573e-05, %v1656_v53 }
 0x12a   :  { %v459_v57 = vadd.f32 0.112945676, %v458_v23  ;;  %v498_v38 = vmul.f32 %v497_v16, %v1629_v4  ;;  %v534_v36 = vmul.f32 3.8918573e-05, %v1669_v13  ;;  %v939_v48 = vmul.f32 %v923_v60, %v1581_v56 }
 0x12b   :  { %v940_v0 = vmul.f32 %v924_v47, %v1624_v55  ;;  %v708_v40 = vadd.f32 %v1289_v1, %v707_v3  ;;  %v776_v8 = vmul.f32 %v775_v61, %v1609_v33  ;;  %v815_v30 = vadd.f32 0.001143296, %v814_v17 }
 0x12c   :  { %v1291_v52 = vpop.eup %1290  ;;  %v460_v2 = vmul.f32 %v459_v57, %v1592_v5  ;;  %v499_v43 = vadd.f32 0.112945676, %v498_v38  ;;  %v535_v59 = vadd.f32 0.001143296, %v534_v36  ;;  %v574_v56 = vmul.f32 3.8918573e-05, %v1713_v18 }
 0x12d   :  { %v954_v49 = vpack.c.bf16 %v940_v0, %v939_v48  ;;  %v712_v51 = vsel %vm711_vm11, %v1289_v1, %v708_v40  ;;  %v745_v24 = vmul.f32 %v1291_v52, %v1940_v28  ;;  %v777_v22 = vadd.f32 0.014752088, %v776_v8 }
 0x12e   :  { %v717_v55 = vsel %vm1950_vm9, %v716_v45, %v712_v51  ;;  %v461_v12 = vadd.f32 0.4994258, %v460_v2  ;;  %v500_v29 = vmul.f32 %v499_v43, %v1629_v4  ;;  %vm750_vm12 = vweird.f32 %v1291_v52 }
 0x12f   :  { %v746_v7 = vsub.f32 1.0, %v745_v24  ;;  %v816_v39 = vmul.f32 %v815_v30, %v1656_v53  ;;  %v536_v54 = vmul.f32 %v535_v59, %v1669_v13  ;;  %v718_v63 = vmul.f32 %v717_v55, %v1782_v62  ;;  %v2169_v24 = vld [vmem:[#allocation12_spill] sm:$0xff] }
 0x130   :  { %v462_v1 = vmul.f32 %v461_v12, %v1592_v5  ;;  %v501_v25 = vadd.f32 0.4994258, %v500_v29  ;;  %v778_v58 = vmul.f32 %v777_v22, %v1609_v33  ;;  %1042 = vmatmul.bf16.gmra.mxu1 %v954_v49  ;;  %v575_v37 = vadd.f32 0.001143296, %v574_v56 }
 0x131   :  { %v747_v42 = vmul.f32 %v1291_v52, %v746_v7  ;;  %v817_v21 = vadd.f32 0.014752088, %v816_v39  ;;  %v537_v10 = vadd.f32 0.014752088, %v536_v54  ;;  %v570_v45 = vadd.f32 0.18741608, %v1840_v26 }
 0x132   :  { %v1979_v32 = vadd.f32 1.0, %v462_v1  ;;  %v502_v15 = vmul.f32 %v501_v25, %v1629_v4  ;;  %v779_v60 = vadd.f32 0.112945676, %v778_v58  ;;  %vm749_vm13 = vweird.f32 %v1940_v28  ;;  %v2170_v7 = vld [vmem:[#allocation14_spill] sm:$0xff] }
 0x133   :  { %v748_v27 = vadd.f32 %v1291_v52, %v747_v42  ;;  %vm754_vm14 = vcmp.eq.f32.partialorder %v753_v50, 8.507059e+37  ;;  %v818_v5 = vmul.f32 %v817_v21, %v1656_v53  ;;  %v1188_v62 = vclamps-f32 %v718_v63, 1.0  ;;  %vm751_vm15 = vmor %vm749_vm13, %vm750_vm12  ;;  %v2168_v50 = vld [vmem:[#allocation15_spill] sm:$0xff] }
 0x134   :  { %v756_v23 = vor.u32 1.1754944e-38, %v755_v14  ;;  %1292 = vrcp.f32 %v1979_v32  ;;  %v538_v16 = vmul.f32 %v537_v10, %v1669_v13  ;;  %v1987_v47 = vadd.f32 1.0, %v502_v15 }
 0x135   :  { %v752_v26 = vsel %vm751_vm15, %v1291_v52, %v748_v27  ;;  %v780_v4 = vmul.f32 %v779_v60, %v1609_v33  ;;  %v576_v3 = vmul.f32 %v575_v37, %v1713_v18  ;;  %v1993_v28 = vmul.f32 %v1784_v41, %v1639_v11 }
 0x136   :  { %v1997_v61 = vmul.f32 %v1835_v19, %v2168_v50  ;;  %v757_v14 = vsel %vm754_vm14, %v756_v23, %v752_v26  ;;  %v819_v57 = vadd.f32 0.112945676, %v818_v5  ;;  %v2000_v38 = vmul.f32 %v570_v45, %v1713_v18 }
 0x137   :  { %v2004_v17 = vmul.f32 %v1837_v9, %v1756_v44  ;;  %v758_v36 = vmul.f32 %v757_v14, %v1798_v46  ;;  %1294 = vrcp.f32 %v1987_v47  ;;  %v931_v48 = vadd.f32 1.0, %v1188_v62 }
 0x138   :  { %v781_v11 = vadd.f32 0.4994258, %v780_v4  ;;  %v820_v41 = vmul.f32 %v819_v57, %v1656_v53  ;;  %v539_v0 = vadd.f32 0.112945676, %v538_v16  ;;  %vm469_vm0 = vweird.f32 %v1979_v32 }
 0x139   :  { %v1189_v19 = vclamps-f32 %v758_v36, 1.0  ;;  %v577_v40 = vadd.f32 0.014752088, %v576_v3  ;;  %v854_v8 = vmul.f32 3.8918573e-05, %v1694_v6  ;;  %v475_v49 = vand.u32 2147483648, %v1979_v32 }
 0x13a   :  { %v1293_v52 = vpop.eup %1292  ;;  %v473_v2 = vand.u32 2147483647, %v1979_v32  ;;  %v782_v9 = vmul.f32 %v781_v11, %v1609_v33  ;;  %v821_v43 = vadd.f32 0.4994258, %v820_v41  ;;  %v540_v46 = vmul.f32 %v539_v0, %v1669_v13 }
 0x13b   :  { %v932_v30 = vadd.f32 1.0, %v1189_v19  ;;  %v465_v59 = vmul.f32 %v1293_v52, %v1979_v32  ;;  %v578_v51 = vmul.f32 %v577_v40, %v1713_v18  ;;  %v947_v56 = vmul.f32 %v931_v48, %v2169_v24 }
 0x13c   :  { %v2018_v55 = vadd.f32 1.0, %v782_v9  ;;  %v822_v12 = vmul.f32 %v821_v43, %v1656_v53  ;;  %v541_v29 = vadd.f32 0.4994258, %v540_v46  ;;  %v855_v63 = vadd.f32 0.001143296, %v854_v8 }
 0x13d   :  { %v1295_v22 = vpop.eup %1294  ;;  %v948_v33 = vmul.f32 %v932_v30, %v2170_v7  ;;  %v466_v39 = vsub.f32 1.0, %v465_v59  ;;  %v579_v54 = vadd.f32 0.112945676, %v578_v51  ;;  %vm2022_vm1 = vcmp.eq.f32.partialorder %v473_v2, 8.507059e+37 }
 0x13e   :  { %v505_v25 = vmul.f32 %v1295_v22, %v1987_v47  ;;  %v513_v58 = vand.u32 2147483647, %v1987_v47  ;;  %1296 = vrcp.f32 %v2018_v55  ;;  %vm470_vm2 = vweird.f32 %v1293_v52 }
 0x13f   :  { %v958_v42 = vpack.c.bf16 %v948_v33, %v947_v56  ;;  %v467_v21 = vmul.f32 %v1293_v52, %v466_v39  ;;  %v515_v53 = vand.u32 2147483648, %v1987_v47  ;;  %v2030_v37 = vadd.f32 1.0, %v822_v12  ;;  %vm471_vm4 = vmor %vm469_vm0, %vm470_vm2 }
 0x140   :  { %v506_v10 = vsub.f32 1.0, %v505_v25  ;;  %v542_v45 = vmul.f32 %v541_v29, %v1669_v13  ;;  %v580_v15 = vmul.f32 %v579_v54, %v1713_v18  ;;  %v476_v27 = vor.u32 1.1754944e-38, %v475_v49 }
 0x141   :  { %1062 = vmatmul.bf16.gmra.mxu3 %v958_v42  ;;  %v468_v60 = vadd.f32 %v1293_v52, %v467_v21  ;;  %vm509_vm3 = vweird.f32 %v1987_v47  ;;  %v856_v5 = vmul.f32 %v855_v63, %v1694_v6  ;;  %vm510_vm5 = vweird.f32 %v1295_v22 }
 0x142   :  { %v507_v62 = vmul.f32 %v1295_v22, %v506_v10  ;;  %v793_v23 = vand.u32 2147483647, %v2018_v55  ;;  %1298 = vrcp.f32 %v2030_v37  ;;  %vm2040_vm6 = vcmp.eq.f32.partialorder %v513_v58, 8.507059e+37  ;;  %vm511_vm7 = vmor %vm509_vm3, %vm510_vm5  ;;  %v2179_v58 = vld [vmem:[#allocation23_spill] sm:$0xff] }
 0x143   :  { %v472_v16 = vsel %vm471_vm4, %v1293_v52, %v468_v60  ;;  %v516_v26 = vor.u32 1.1754944e-38, %v515_v53  ;;  %v2044_v4 = vadd.f32 1.0, %v542_v45  ;;  %v581_v14 = vadd.f32 0.4994258, %v580_v15 }
 0x144   :  { %v1297_v3 = vpop.eup %1296  ;;  %v477_v50 = vsel %vm2022_vm1, %v476_v27, %v472_v16  ;;  %v508_v32 = vadd.f32 %v1295_v22, %v507_v62  ;;  %v857_v57 = vadd.f32 0.014752088, %v856_v5  ;;  %v795_v11 = vand.u32 2147483648, %v2018_v55 }
 0x145   :  { %v478_v36 = vmul.f32 %v477_v50, %v1809_v35  ;;  %v785_v48 = vmul.f32 %v1297_v3, %v2018_v55  ;;  %v894_v41 = vmul.f32 3.8918573e-05, %v1756_v44  ;;  %vm789_vm8 = vweird.f32 %v2018_v55 }
 0x146   :  { %v512_v0 = vsel %vm511_vm7, %v1295_v22, %v508_v32  ;;  %vm2055_vm9 = vcmp.eq.f32.partialorder %v793_v23, 8.507059e+37  ;;  %1300 = vrcp.f32 %v2044_v4  ;;  %v833_v8 = vand.u32 2147483647, %v2030_v37 }
 0x147   :  { %v1182_v40 = vclamps-f32 %v478_v36, 1.0  ;;  %v517_v35 = vsel %vm2040_vm6, %v516_v26, %v512_v0  ;;  %v786_v47 = vsub.f32 1.0, %v785_v48  ;;  %v835_v9 = vand.u32 2147483648, %v2030_v37 }
 0x148   :  { %v1299_v52 = vpop.eup %1298  ;;  %v518_v2 = vmul.f32 %v517_v35, %v1833_v34  ;;  %v582_v43 = vmul.f32 %v581_v14, %v1713_v18  ;;  %v858_v46 = vmul.f32 %v857_v57, %v1694_v6  ;;  %vm790_vm10 = vweird.f32 %v1297_v3 }
 0x149   :  { %v787_v30 = vmul.f32 %v1297_v3, %v786_v47  ;;  %v796_v59 = vor.u32 1.1754944e-38, %v795_v11  ;;  %v825_v49 = vmul.f32 %v1299_v52, %v2030_v37  ;;  %v925_v24 = vadd.f32 1.0, %v1182_v40  ;;  %vm791_vm13 = vmor %vm789_vm8, %vm790_vm10 }
 0x14a   :  { %v1183_v51 = vclamps-f32 %v518_v2, 1.0  ;;  %vm829_vm11 = vweird.f32 %v2030_v37  ;;  %v2069_v56 = vadd.f32 1.0, %v582_v43  ;;  %vm2071_vm12 = vcmp.eq.f32.partialorder %v833_v8, 8.507059e+37 }
 0x14b   :  { %v788_v12 = vadd.f32 %v1297_v3, %v787_v30  ;;  %v826_v29 = vsub.f32 1.0, %v825_v49  ;;  %v859_v18 = vadd.f32 0.112945676, %v858_v46  ;;  %v836_v33 = vor.u32 1.1754944e-38, %v835_v9  ;;  %v2181_v9 = vld [vmem:[#allocation21_spill] sm:$0xff]  ;;  %v2182_v46 = vld [vmem:[#allocation24_spill] sm:$0xff] }
 0x14c   :  { %v1301_v22 = vpop.eup %1300  ;;  %v926_v7 = vadd.f32 1.0, %v1183_v51  ;;  %1302 = vrcp.f32 %v2069_v56  ;;  %v895_v39 = vadd.f32 0.001143296, %v894_v41  ;;  %vm830_vm14 = vweird.f32 %v1299_v52  ;;  %v2183_v51 = vld [vmem:[#allocation19_spill] sm:$0xff] }
 0x14d   :  { %v792_v54 = vsel %vm791_vm13, %v1297_v3, %v788_v12  ;;  %v827_v63 = vmul.f32 %v1299_v52, %v826_v29  ;;  %v545_v1 = vmul.f32 %v1301_v22, %v2044_v4  ;;  %v941_v25 = vmul.f32 %v925_v24, %v1716_v31  ;;  %vm831_vm15 = vmor %vm829_vm11, %vm830_vm14 }
 0x14e   :  { %v942_v42 = vmul.f32 %v926_v7, %v2179_v58  ;;  %v797_v21 = vsel %vm2055_vm9, %v796_v59, %v792_v54  ;;  %v553_v53 = vand.u32 2147483647, %v2044_v4  ;;  %v860_v15 = vmul.f32 %v859_v18, %v1694_v6 }
 0x14f   :  { %v798_v55 = vmul.f32 %v797_v21, %v1813_v20  ;;  %v828_v10 = vadd.f32 %v1299_v52, %v827_v63  ;;  %v546_v45 = vsub.f32 1.0, %v545_v1  ;;  %vm550_vm0 = vweird.f32 %v1301_v22 }
 0x150   :  { %v955_v60 = vpack.c.bf16 %v942_v42, %v941_v25  ;;  %v555_v31 = vand.u32 2147483648, %v2044_v4  ;;  %v896_v27 = vmul.f32 %v895_v39, %v1756_v44  ;;  %v861_v16 = vadd.f32 0.4994258, %v860_v15  ;;  %v2184_v42 = vld [vmem:[#allocation13_spill] sm:$0xff] }
 0x151   :  { %v1190_v5 = vclamps-f32 %v798_v55, 1.0  ;;  %v832_v62 = vsel %vm831_vm15, %v1299_v52, %v828_v10  ;;  %v547_v23 = vmul.f32 %v1301_v22, %v546_v45  ;;  %v572_v20 = vadd.f32 1.1283791, %v2000_v38  ;;  %v2180_v52 = vld [vmem:[#allocation25_spill] sm:$0xff] }
 0x152   :  { %v1303_v13 = vpop.eup %1302  ;;  %1047 = vmatmul.bf16.gmra.mxu1 %v955_v60  ;;  %v837_v26 = vsel %vm2071_vm12, %v836_v33, %v832_v62  ;;  %vm549_vm1 = vweird.f32 %v2044_v4  ;;  %v897_v37 = vadd.f32 0.014752088, %v896_v27  ;;  %vm554_vm2 = vcmp.eq.f32.partialorder %v553_v53, 8.507059e+37  ;;  %v2185_v53 = vld [vmem:[#allocation17_spill] sm:$0xff] }
 0x153   :  { %v838_v3 = vmul.f32 %v837_v26, %v1993_v28  ;;  %v548_v50 = vadd.f32 %v1301_v22, %v547_v23  ;;  %v585_v32 = vmul.f32 %v1303_v13, %v2069_v56  ;;  %vm551_vm3 = vmor %vm549_vm1, %vm550_vm0  ;;  %v556_v14 = vor.u32 1.1754944e-38, %v555_v31 }
 0x154   :  { %v593_v57 = vand.u32 2147483647, %v2069_v56  ;;  %v862_v38 = vmul.f32 %v861_v16, %v1694_v6  ;;  %v898_v36 = vmul.f32 %v897_v37, %v1756_v44  ;;  %v933_v11 = vadd.f32 1.0, %v1190_v5 }
 0x155   :  { %v1191_v48 = vclamps-f32 %v838_v3, 1.0  ;;  %v552_v41 = vsel %vm551_vm3, %v1301_v22, %v548_v50  ;;  %v586_v4 = vsub.f32 1.0, %v585_v32  ;;  %v595_v28 = vand.u32 2147483648, %v2069_v56 }
 0x156   :  { %v557_v0 = vsel %vm554_vm2, %v556_v14, %v552_v41  ;;  %v863_v19 = vadd.f32 1.0, %v862_v38  ;;  %v899_v40 = vadd.f32 0.112945676, %v898_v36  ;;  %vm590_vm4 = vweird.f32 %v1303_v13  ;;  %v2186_v14 = vld [vmem:[#allocation18_spill] sm:$0xff] }
 0x157   :  { %v934_v35 = vadd.f32 1.0, %v1191_v48  ;;  %v558_v47 = vmul.f32 %v557_v0, %v1997_v61  ;;  %v587_v8 = vmul.f32 %v1303_v13, %v586_v4  ;;  %v849_v2 = vmul.f32 %v2180_v52, %v1694_v6 }
 0x158   :  { %vm589_vm5 = vweird.f32 %v2069_v56  ;;  %1304 = vrcp.f32 %v863_v19  ;;  %v949_v43 = vmul.f32 %v933_v11, %v2181_v9  ;;  %v900_v49 = vmul.f32 %v899_v40, %v1756_v44  ;;  %v2188_v9 = vld [vmem:[#allocation16_spill] sm:$0xff] }
 0x159   :  { %v950_v30 = vmul.f32 %v934_v35, %v2182_v46  ;;  %v588_v59 = vadd.f32 %v1303_v13, %v587_v8  ;;  %v573_v24 = vmul.f32 %v572_v20, %v2183_v51  ;;  %v888_v12 = vadd.f32 0.05243302, %v2004_v17  ;;  %vm591_vm6 = vmor %vm589_vm5, %vm590_vm4  ;;  %v2189_v46 = vld [vmem:[#allocation20_spill] sm:$0xff] }
 0x15a   :  { %vm594_vm7 = vcmp.eq.f32.partialorder %v593_v57, 8.507059e+37  ;;  %v596_v61 = vor.u32 1.1754944e-38, %v595_v28  ;;  %v1184_v34 = vclamps-f32 %v558_v47, 1.0  ;;  %v901_v22 = vadd.f32 0.4994258, %v900_v49 }
 0x15b   :  { %v959_v29 = vpack.c.bf16 %v950_v30, %v949_v43  ;;  %v592_v18 = vsel %vm591_vm6, %v1303_v13, %v588_v59  ;;  %v850_v54 = vadd.f32 0.18741608, %v849_v2  ;;  %v889_v63 = vmul.f32 %v888_v12, %v1756_v44  ;;  %v1275_v12 = vld [vmem:[%s2130_s4] ss:$0 sm:$0xff]  ;;  %s1415_s4 = smov [#allocation8]  }
 0x15c   :  { %v597_v56 = vsel %vm594_vm7, %v596_v61, %v592_v18  ;;  %v902_v33 = vmul.f32 %v901_v22, %v1756_v44  ;;  %v927_v25 = vadd.f32 1.0, %v1184_v34  ;;  %v255_v21 = vmul.f32 0.5, %v2184_v42  ;;  %s1098_s10 = sshll.u32 %s1415_s4, 4  ;;  %s1099_s10 = int_to_ptr.vmem [resolvable:$true] %s1098_s10 }
 0x15d   :  { %1067 = vmatmul.bf16.gmra.mxu3 %v959_v29  ;;  %v598_v7 = vmul.f32 %v597_v56, %v573_v24  ;;  %v256_v55 = vmul.f32 0.5, %v2185_v53  ;;  %v851_v15 = vmul.f32 %v850_v54, %v1694_v6  ;;  %v890_v60 = vadd.f32 0.18741608, %v889_v63 }
 0x15e   :  { %v1305_v39 = vpop.eup %1304  ;;  %v903_v17 = vadd.f32 1.0, %v902_v33  ;;  %v875_v31 = vand.u32 2147483648, %v863_v19  ;;  %v943_v27 = vmul.f32 %v927_v25, %v255_v21  ;;  %v873_v23 = vand.u32 2147483647, %v863_v19 }
 0x15f   :  { %v1185_v1 = vclamps-f32 %v598_v7, 1.0  ;;  %v865_v58 = vmul.f32 %v1305_v39, %v863_v19  ;;  %vm870_vm8 = vweird.f32 %v1305_v39  ;;  %vm869_vm9 = vweird.f32 %v863_v19 }
 0x160   :  { %1306 = vrcp.f32 %v903_v17  ;;  %v852_v20 = vadd.f32 1.1283791, %v851_v15  ;;  %vm871_vm10 = vmor %vm869_vm9, %vm870_vm8  ;;  %v891_v37 = vmul.f32 %v890_v60, %v1756_v44  ;;  %v876_v50 = vor.u32 1.1754944e-38, %v875_v31  ;;  %v2187_v44 = vld [vmem:[#allocation22_spill] sm:$0xff] }
 0x161   :  { %v928_v10 = vadd.f32 1.0, %v1185_v1  ;;  %v866_v45 = vsub.f32 1.0, %v865_v58  ;;  %vm874_vm11 = vcmp.eq.f32.partialorder %v873_v23, 8.507059e+37  ;;  %v915_v48 = vand.u32 2147483648, %v903_v17 }
 0x162   :  { %v853_v57 = vmul.f32 %v852_v20, %v2186_v14  ;;  %v892_v36 = vadd.f32 1.1283791, %v891_v37  ;;  %v913_v4 = vand.u32 2147483647, %v903_v17  ;;  %vm909_vm13 = vweird.f32 %v903_v17 }
 0x163   :  { %v944_v5 = vmul.f32 %v928_v10, %v256_v55  ;;  %v867_v62 = vmul.f32 %v1305_v39, %v866_v45  ;;  %v916_v28 = vor.u32 1.1754944e-38, %v915_v48  ;;  %v263_v43 = vmul.f32 0.5, %v2188_v9 }
 0x164   :  { %v893_v19 = vmul.f32 %v892_v36, %v2187_v44  ;;  %vm914_vm15 = vcmp.eq.f32.partialorder %v913_v4, 8.507059e+37  ;;  %v264_v30 = vmul.f32 0.5, %v2189_v46 }
 0x165   :  { %v956_v16 = vpack.c.bf16 %v944_v5, %v943_v27  ;;  %v868_v13 = vadd.f32 %v1305_v39, %v867_v62 }
 0x166   :  { %v1307_v26 = vpop.eup %1306 }
 0x167   :  { %1052 = vmatmul.bf16.gmra.mxu1 %v956_v16  ;;  %v872_v3 = vsel %vm871_vm10, %v1305_v39, %v868_v13  ;;  %v905_v6 = vmul.f32 %v1307_v26, %v903_v17  ;;  %vm910_vm12 = vweird.f32 %v1307_v26 }
 0x168   :  { %v877_v32 = vsel %vm874_vm11, %v876_v50, %v872_v3  ;;  %vm911_vm14 = vmor %vm909_vm13, %vm910_vm12 }
 0x169   :  { %v906_v38 = vsub.f32 1.0, %v905_v6  ;;  %v878_v11 = vmul.f32 %v877_v32, %v853_v57 }
 0x16b   :  { %v907_v41 = vmul.f32 %v1307_v26, %v906_v38  ;;  %v1192_v40 = vclamps-f32 %v878_v11, 1.0 }
 0x16d   :  { %v908_v0 = vadd.f32 %v1307_v26, %v907_v41  ;;  %v935_v2 = vadd.f32 1.0, %v1192_v40 }
 0x16f   :  { %v912_v35 = vsel %vm911_vm14, %v1307_v26, %v908_v0  ;;  %v951_v49 = vmul.f32 %v935_v2, %v263_v43 }
 0x170   :  { %v917_v47 = vsel %vm914_vm15, %v916_v28, %v912_v35 }
 0x171   :  { %v918_v8 = vmul.f32 %v917_v47, %v893_v19 }
 0x173   :  { %v1193_v52 = vclamps-f32 %v918_v8, 1.0 }
 0x175   :  { %v936_v59 = vadd.f32 1.0, %v1193_v52 }
 0x177   :  { %v952_v51 = vmul.f32 %v936_v59, %v264_v30 }
 0x179   :  { %v960_v24 = vpack.c.bf16 %v952_v51, %v951_v49 }
 0x17b   :  { %1072 = vmatmul.bf16.gmra.mxu3 %v960_v24 }
 0x19d   :  { %v1038_v61 = vpop.f32.mrf.mxu1 }
 0x19e   :  { %v1039_v29 = vadd.f32 %v1275_v12, %v1038_v61 }
 0x1a0   :  { %1078 = vst [vmem:[#allocation8] sm:$0xff] %v1039_v29 }
 0x1a5   :  { %v1040_v34 = vpop.f32.mrf.mxu1 }
 0x1a6   :  { %v1041_v18 = vadd.f32 %v1275_v12, %v1040_v34 }
 0x1a8   :  { %1079 = vst [vmem:[#allocation8 + $0x8] sm:$0xff] %v1041_v18 }
 0x1ac   :  { %v1058_v22 = vpop.f32.mrf.mxu3 }
 0x1ad   :  { %v1059_v56 = vadd.f32 %v1275_v12, %v1058_v22  ;;  %v1043_v7 = vpop.f32.mrf.mxu1 }
 0x1ae   :  { %v1044_v33 = vadd.f32 %v1275_v12, %v1043_v7 }
 0x1af   :  { %1086 = vst [vmem:[#allocation8 + $0x40] sm:$0xff] %v1059_v56 }
 0x1b0   :  { %1080 = vst [vmem:[#allocation8 + $0x10] sm:$0xff] %v1044_v33 }
 0x1b4   :  { %v1060_v39 = vpop.f32.mrf.mxu3 }
 0x1b5   :  { %v1061_v54 = vadd.f32 %v1275_v12, %v1060_v39  ;;  %v1045_v63 = vpop.f32.mrf.mxu1 }
 0x1b6   :  { %v1046_v1 = vadd.f32 %v1275_v12, %v1045_v63 }
 0x1b7   :  { %1087 = vst [vmem:[#allocation8 + $0x48] sm:$0xff] %v1061_v54 }
 0x1b8   :  { %1081 = vst [vmem:[#allocation8 + $0x18] sm:$0xff] %v1046_v1 }
 0x1c4   :  { %v1063_v25 = vpop.f32.mrf.mxu3 }
 0x1c5   :  { %v1064_v58 = vadd.f32 %v1275_v12, %v1063_v25 }
 0x1c7   :  { %1088 = vst [vmem:[#allocation8 + $0x50] sm:$0xff] %v1064_v58 }
 0x1cc   :  { %v1065_v17 = vpop.f32.mrf.mxu3 }
 0x1cd   :  { %v1066_v42 = vadd.f32 %v1275_v12, %v1065_v17 }
 0x1cf   :  { %v1048_v21 = vpop.f32.mrf.mxu1  ;;  %1089 = vst [vmem:[#allocation8 + $0x58] sm:$0xff] %v1066_v42 }
 0x1d0   :  { %v1049_v53 = vadd.f32 %v1275_v12, %v1048_v21 }
 0x1d2   :  { %1082 = vst [vmem:[#allocation8 + $0x20] sm:$0xff] %v1049_v53 }
 0x1d7   :  { %v1050_v55 = vpop.f32.mrf.mxu1 }
 0x1d8   :  { %v1051_v10 = vadd.f32 %v1275_v12, %v1050_v55 }
 0x1da   :  { %1083 = vst [vmem:[#allocation8 + $0x28] sm:$0xff] %v1051_v10 }
 0x1e0   :  { %v1068_v45 = vpop.f32.mrf.mxu3 }
 0x1e1   :  { %v1069_v15 = vadd.f32 %v1275_v12, %v1068_v45 }
 0x1e3   :  { %1090 = vst [vmem:[#allocation8 + $0x60] sm:$0xff] %v1069_v15 }
 0x1e4   :  { %v1053_v60 = vpop.f32.mrf.mxu1 }
 0x1e5   :  { %v1054_v31 = vadd.f32 %v1275_v12, %v1053_v60 }
 0x1e7   :  { %1084 = vst [vmem:[#allocation8 + $0x30] sm:$0xff] %v1054_v31 }
 0x1e8   :  { %v1070_v27 = vpop.f32.mrf.mxu3 }
 0x1e9   :  { %v1071_v5 = vadd.f32 %v1275_v12, %v1070_v27 }
 0x1eb   :  { %1091 = vst [vmem:[#allocation8 + $0x68] sm:$0xff] %v1071_v5 }
 0x1ec   :  { %v1055_v62 = vpop.f32.mrf.mxu1 }
 0x1ed   :  { %v1056_v23 = vadd.f32 %v1275_v12, %v1055_v62 }
 0x1ef   :  { %1085 = vst [vmem:[#allocation8 + $0x38] sm:$0xff] %v1056_v23 }
 0x1fe   :  { %v1073_v16 = vpop.f32.mrf.mxu3 }
 0x1ff   :  { %v1074_v13 = vadd.f32 %v1275_v12, %v1073_v16 }
 0x201   :  { %1092 = vst [vmem:[#allocation8 + $0x70] sm:$0xff] %v1074_v13 }
 0x206   :  { %v1075_v20 = vpop.f32.mrf.mxu3 }
 0x207   :  { %v1076_v26 = vadd.f32 %v1275_v12, %v1075_v20 }
 0x209   :  { %1093 = vst [vmem:[#allocation8 + $0x78] sm:$0xff] %v1076_v26 }
 0x20a   :  { %1106 = dma.vmem_to_hbm [thread:$0]  %s1099_s10, 2048, %s1101_s13, [#allocation4], %s1416_s14, %s1416_s14, %s1417_s15  }
 0x20b   :  { %1408 = dma.done.wait [#allocation4], 2048  }
 0x20c   :  { %1409 = vsyncadd [#allocation4], 4294965248 }
 0x20d   :  { %1111 = vsyncpa [#allocation3], 1 }
 0x20e   :  { %1112 = vsyncpa [#allocation6], 1 }
 0x20f   :  { %1113 = vsyncpa [#allocation4], 1 }

</bundles_post_ra>
